<compile_context>
chip_gen: v7x
topology: tpu7x:2x2x1
jax: 0.10.0
libtpu: 0.0.40
codegen_flags: <defaults>
</compile_context>

<pallas_src>
import functools

import jax
import jax.numpy as jnp
from jax import lax
from jax.experimental import pallas as pl
from jax.experimental.pallas import tpu as pltpu

SCORE_PAD = 128                      # lane-dense width for the score head output
VMEM_LIMIT = 32 * 1024 * 1024        # explicit scoped-VMEM limit (safe on v5e/v6e/v7x)
BRANCHES = ("attribute", "relation", "scene")


def _round_up(x, m):
    return ((x + m - 1) // m) * m


def _choose_point_tile(n, max_tile=1024):
    # Lane-dense tiles: multiples of 128 along the point axis.
    # TODO(synk): lower max_tile on v7x (64 MiB VMEM) if F or nb grow.
    return min(_round_up(n, 128), max_tile)


# ----------------------------------------------------------------------------
# Kernel 1: GRU language encoder (gate-fused).
#   x   : (T*B, D) bf16   time-major, batch collapsed into rows (B padded to 8)
#   wih : (D, 3H) bf16    gates [r | z | n] along columns
#   whh : (H, 3H) bf16
#   bih : (1, 3H) f32
#   bhh : (1, 3H) f32
# The input projection for all T steps and all gates is one wide matmul before
# the recurrence; each step does a single (B,H)x(H,3H) matmul and slices the
# r/z/n lanes (H is a multiple of 128 -> clean vreg slices).
# Gate math matches PyTorch: n = tanh(W_in x + b_in + r * (W_hn h + b_hn)).
# ----------------------------------------------------------------------------
def gru_kernel(x_ref, wih_ref, whh_ref, bih_ref, bhh_ref, h_out_ref, gi_s):
    TB = x_ref.shape[0]
    B, H = h_out_ref.shape
    T = TB // B

    # Hoisted input->hidden projection, single (T*B, D) x (D, 3H) matmul.
    gi_s[...] = (jnp.dot(x_ref[...], wih_ref[...],
                         preferred_element_type=jnp.float32) + bih_ref[...])

    whh = whh_ref[...]                                       # (H, 3H) bf16, resident
    bhh = bhh_ref[...]                                       # (1, 3H) f32

    def step(t, h):
        gh = jnp.dot(h.astype(jnp.bfloat16), whh,
                     preferred_element_type=jnp.float32) + bhh         # (B, 3H)
        row = pl.multiple_of(t * B, B)                                  # B is a multiple of 8
        gi = gi_s[pl.ds(row, B), :]                                     # (B, 3H)
        r = jax.nn.sigmoid(gi[:, :H] + gh[:, :H])
        z = jax.nn.sigmoid(gi[:, H:2 * H] + gh[:, H:2 * H])
        n = jnp.tanh(gi[:, 2 * H:] + r * gh[:, 2 * H:])
        return (1.0 - z) * n + z * h

    h0 = jnp.zeros((B, H), jnp.float32)
    # Short static T: unroll so the LLO scheduler overlaps EUP sigmoid/tanh with
    # the next step's MXU work.
    h_out_ref[...] = lax.fori_loop(0, T, step, h0, unroll=True)


def run_lang_gru(lang_feat, p):
    B0, T, D = lang_feat.shape
    H3 = p["whh"].shape[1]
    H = H3 // 3
    B = max(_round_up(B0, 8), 8)                 # sublane-pad the batch

    x = jnp.zeros((T, B, D), jnp.float32).at[:, :B0, :].set(
        jnp.transpose(lang_feat, (1, 0, 2)))
    x = x.reshape(T * B, D).astype(jnp.bfloat16)

    vmem = pl.BlockSpec(memory_space=pltpu.MemorySpace.VMEM)
    h = pl.pallas_call(
        gru_kernel,
        out_shape=jax.ShapeDtypeStruct((B, H), jnp.float32),
        in_specs=[vmem] * 5,
        out_specs=vmem,
        scratch_shapes=[pltpu.VMEM((T * B, H3), jnp.float32)],
        compiler_params=pltpu.CompilerParams(vmem_limit_bytes=VMEM_LIMIT),
    )(x, p["wih"], p["whh"], p["bih"], p["bhh"])
    return h[:B0]


# ----------------------------------------------------------------------------
# Kernel 2: fused point-feature branches (attribute / relation / scene).
# grid = (batch [parallel], point-tile [arbitrary]).
#   pts   : (Cin_pad, B*N_pad) bf16   lane-dense points, one (Cin_pad, TN) tile/step
#   lang  : (B, 1, H) bf16            one (1, 1, H) row per batch
#   branch weights are stacked along a leading nb axis and loaded ONCE
#   (constant index maps); they stay resident across the whole grid.
# Per tile & branch: h = relu(W2 @ relu(W1 @ X + b1) + b2)  (MXU, f32 acc),
# masked pad columns -> -inf, elementwise running max into VMEM scratch.
# At the last tile of a batch: one cross-lane max per branch, then the fusion
# head with the language embedding produces a 128-lane-padded score.
# ----------------------------------------------------------------------------
def point_module_kernel(pts_ref, lang_ref,
                        w1_ref, b1_ref, w2_ref, b2_ref,
                        wfp_ref, wfl_ref, bf_ref, ws_ref, bs_ref,
                        feat_ref, score_ref, acc_ref, *, n_valid):
    t = pl.program_id(1)
    n_tiles = pl.num_programs(1)
    nb, F, _ = w1_ref.shape
    _, TN = pts_ref.shape

    @pl.when(t == 0)
    def _init():
        acc_ref[...] = jnp.full_like(acc_ref, -jnp.inf)

    x = pts_ref[...]                                          # (Cin_pad, TN) bf16

    # Validity mask over the point (lane) axis of this tile: masks the padded
    # tail of the last tile so pad points never reach the max-pool.
    lane = lax.broadcasted_iota(jnp.int32, (1, TN), 1)
    valid = (t * TN + lane) < n_valid                         # (1, TN) bool

    for br in range(nb):                                      # static unroll, nb = 3
        h1 = jnp.dot(w1_ref[br], x,
                     preferred_element_type=jnp.float32) + b1_ref[br]   # (F, TN)
        h1 = jnp.maximum(h1, 0.0)
        h2 = jnp.dot(w2_ref[br], h1.astype(jnp.bfloat16),
                     preferred_element_type=jnp.float32) + b2_ref[br]   # (F, TN)
        h2 = jnp.maximum(h2, 0.0)
        h2 = jnp.where(valid, h2, -jnp.inf)
        # Elementwise running max (VPU only); the lane reduce happens at finalize.
        acc_ref[br] = jnp.maximum(acc_ref[br], h2)

    @pl.when(t == n_tiles - 1)
    def _finalize():
        lang_row = lang_ref[0]                                # (1, H) bf16
        feat_rows = []
        score_rows = []
        for br in range(nb):
            feat_row = jnp.max(acc_ref[br], axis=-1).reshape(1, F)      # (1, F) f32
            fused = (jnp.dot(feat_row.astype(jnp.bfloat16), wfp_ref[br],
                             preferred_element_type=jnp.float32)
                     + jnp.dot(lang_row, wfl_ref[br],
                               preferred_element_type=jnp.float32)
                     + bf_ref[br])
            hf = jnp.maximum(fused, 0.0)
            # 128-lane-padded score head -> lane-dense store; real score = col 0.
            sc = (jnp.dot(hf.astype(jnp.bfloat16), ws_ref[br],
                          preferred_element_type=jnp.float32) + bs_ref[br])
            feat_rows.append(feat_row)
            score_rows.append(sc)
        feat_ref[...] = jnp.concatenate(feat_rows, axis=0)[None]        # (1, nb, F)
        score_ref[...] = jnp.concatenate(score_rows, axis=0)[None]      # (1, nb, 128)


def run_point_modules(points, lang_emb, p):
    """points: (B0, N, Cin); lang_emb: (B0, H); p: branch-stacked params."""
    nb, F, CP = p["w1"].shape
    H = p["wfl"].shape[1]
    B0, N, C = points.shape
    B = max(_round_up(B0, 8), 8)
    TN = _choose_point_tile(N)
    N_pad = _round_up(N, TN)
    tpb = N_pad // TN                                  # point tiles per batch

    # Repack points lane-dense: (Cin_pad, B*N_pad), points of batch b occupy
    # columns [b*N_pad, (b+1)*N_pad).  Pads (batch, points, channels) with zeros.
    pts = jnp.zeros((B, N_pad, CP), jnp.float32).at[:B0, :N, :C].set(points)
    pts_packed = (jnp.transpose(pts, (2, 0, 1))
                  .reshape(CP, B * N_pad)
                  .astype(jnp.bfloat16))

    lang = (jnp.zeros((B, 1, H), jnp.float32).at[:B0, 0, :].set(lang_emb)
            .astype(jnp.bfloat16))

    kernel = functools.partial(point_module_kernel, n_valid=N)

    const = lambda b, t: (0, 0, 0)                     # weights: DMA'd once, resident
    grid_spec = pltpu.PrefetchScalarGridSpec(
        num_scalar_prefetch=0,
        grid=(B, tpb),
        in_specs=[
            # Lane-dense point tile; streamed exactly once.
            # TODO(synk): add pipeline_mode=pl.Buffered(3) here if profiling
            # still shows exposed point DMA.
            pl.BlockSpec((CP, TN), lambda b, t: (0, b * tpb + t)),
            pl.BlockSpec((1, 1, H), lambda b, t: (b, 0, 0)),
            pl.BlockSpec((nb, F, CP), const),
            pl.BlockSpec((nb, F, 1), const),
            pl.BlockSpec((nb, F, F), const),
            pl.BlockSpec((nb, F, 1), const),
            pl.BlockSpec((nb, F, F), const),
            pl.BlockSpec((nb, H, F), const),
            pl.BlockSpec((nb, 1, F), const),
            pl.BlockSpec((nb, F, SCORE_PAD), const),
            pl.BlockSpec((nb, 1, SCORE_PAD), const),
        ],
        out_specs=(
            pl.BlockSpec((1, nb, F), lambda b, t: (b, 0, 0)),
            pl.BlockSpec((1, nb, SCORE_PAD), lambda b, t: (b, 0, 0)),
        ),
        scratch_shapes=[pltpu.VMEM((nb, F, TN), jnp.float32)],
    )

    feat, score = pl.pallas_call(
        kernel,
        out_shape=(jax.ShapeDtypeStruct((B, nb, F), jnp.float32),
                   jax.ShapeDtypeStruct((B, nb, SCORE_PAD), jnp.float32)),
        grid_spec=grid_spec,
        compiler_params=pltpu.CompilerParams(
            dimension_semantics=("parallel", "arbitrary"),
            vmem_limit_bytes=VMEM_LIMIT),
    )(pts_packed, lang, p["w1"], p["b1"], p["w2"], p["b2"],
      p["wfp"], p["wfl"], p["bf"], p["ws_pad"], p["bs_pad"])

    return feat[:B0], score[:B0, :, :1]               # (B0, nb, F), (B0, nb, 1)


# ----------------------------------------------------------------------------
# Parameter construction (deterministic, synthetic — no checkpoint load).
# Branch weights are stacked once here (no per-forward jnp.stack).
# Matmul weights are bf16 (MXU inputs); biases stay f32.
# ----------------------------------------------------------------------------
def init_params(key, d_lang, hidden, c_in, feat_dim):
    cp = _round_up(c_in, 8)
    nb = len(BRANCHES)
    keys = jax.random.split(key, 16)
    it = iter(keys)

    def rnd(shape, dtype, scale=0.1):
        return (scale * jax.random.normal(next(it), shape, jnp.float32)).astype(dtype)

    lang = dict(
        wih=rnd((d_lang, 3 * hidden), jnp.bfloat16),   # gates [r | z | n] along columns
        whh=rnd((hidden, 3 * hidden), jnp.bfloat16),
        bih=rnd((1, 3 * hidden), jnp.float32),
        bhh=rnd((1, 3 * hidden), jnp.float32),
    )

    # Point branches, stacked along a leading branch axis (attribute, relation, scene).
    w1 = rnd((nb, feat_dim, cp), jnp.bfloat16)                 # (out, in), Conv1d-style
    w1 = w1.at[:, :, c_in:].set(0)                             # padded input channels
    ws = rnd((nb, feat_dim, 1), jnp.float32)
    bs = rnd((nb, 1, 1), jnp.float32)
    ws_pad = (jnp.zeros((nb, feat_dim, SCORE_PAD), jnp.float32)
              .at[:, :, :1].set(ws).astype(jnp.bfloat16))
    bs_pad = jnp.zeros((nb, 1, SCORE_PAD), jnp.float32).at[:, :, :1].set(bs)
    point = dict(
        w1=w1,
        b1=rnd((nb, feat_dim, 1), jnp.float32),
        w2=rnd((nb, feat_dim, feat_dim), jnp.bfloat16),        # (out, in)
        b2=rnd((nb, feat_dim, 1), jnp.float32),
        wfp=rnd((nb, feat_dim, feat_dim), jnp.bfloat16),       # (in, out) for row-vector head
        wfl=rnd((nb, hidden, feat_dim), jnp.bfloat16),
        bf=rnd((nb, 1, feat_dim), jnp.float32),
        ws_pad=ws_pad,
        bs_pad=bs_pad,
    )
    return dict(lang=lang, point=point)


# ----------------------------------------------------------------------------
# InstanceRefer forward: sequentially enrich the data_dict.
# ----------------------------------------------------------------------------
def instance_refer_forward(data_dict, params,
                           use_attribute=True, use_relation=True, use_scene=True):
    out = dict(data_dict)

    lang_emb = run_lang_gru(out["lang_feat"], params["lang"])
    out["lang_emb"] = lang_emb

    flags = (use_attribute, use_relation, use_scene)
    branches = [n for n, u in zip(BRANCHES, flags) if u]
    if branches:
        if len(branches) == len(BRANCHES):
            stacked = params["point"]                          # no copy in the common case
        else:
            idx = jnp.array([BRANCHES.index(n) for n in branches])
            stacked = {k: jnp.take(v, idx, axis=0) for k, v in params["point"].items()}
        feats, scores = run_point_modules(out["point_clouds"], lang_emb, stacked)
        for i, name in enumerate(branches):
            out[f"{name}_feat"] = feats[:, i, :]
            out[f"{name}_score"] = scores[:, i, :]
    return out


if __name__ == "__main__":
    B = 2                  # batch
    N = 16                 # points per cloud
    input_feature_dim = 4  # extra per-point features -> C = 3 + 4 = 7
    C = 3 + input_feature_dim
    T = 8                  # language sequence length
    D_LANG = 128           # language token feature dim (padded to a full lane tile)
    HIDDEN = 128           # GRU hidden size (full lane tile)
    FEAT = 128             # point-feature width (full lane tile)

    key = jax.random.PRNGKey(0)
    k_pc, k_lang, k_param = jax.random.split(key, 3)

    data_dict = {
        "point_clouds": jax.random.normal(k_pc, (B, N, C), jnp.float32),
        "lang_feat": jax.random.normal(k_lang, (B, T, D_LANG), jnp.float32),
    }
    params = init_params(k_param, D_LANG, HIDDEN, C, FEAT)

    out = instance_refer_forward(data_dict, params)
    jax.block_until_ready(out)

    # light sanity checks on shapes / values
    assert out["lang_emb"].shape == (B, HIDDEN)
    assert out["attribute_feat"].shape == (B, FEAT)
    assert out["attribute_score"].shape == (B, 1)
    assert out["relation_feat"].shape == (B, FEAT)
    assert out["relation_score"].shape == (B, 1)
    assert out["scene_feat"].shape == (B, FEAT)
    assert out["scene_score"].shape == (B, 1)
    assert bool(jnp.all(jnp.isfinite(out["lang_emb"])))
    assert bool(jnp.all(jnp.isfinite(out["attribute_feat"])))
    assert bool(jnp.all(jnp.isfinite(out["relation_score"])))
    assert bool(jnp.all(jnp.isfinite(out["scene_score"])))

    print("KERNEL_OK")
</pallas_src>

<mosaic_0001>
module attributes {stable_mosaic.version = 11 : i64} {
  func.func @gru_kernel(%arg0: memref<64x128xbf16, #tpu.memory_space<vmem>>, %arg1: memref<128x384xbf16, #tpu.memory_space<vmem>>, %arg2: memref<128x384xbf16, #tpu.memory_space<vmem>>, %arg3: memref<1x384xf32, #tpu.memory_space<vmem>>, %arg4: memref<1x384xf32, #tpu.memory_space<vmem>>, %arg5: memref<8x128xf32, #tpu.memory_space<vmem>>, %arg6: memref<64x384xf32, #tpu.memory_space<vmem>>) attributes {dimension_semantics = [], scalar_prefetch = 0 : i64, scratch_operands = 1 : i64, tpu.core_type = #tpu.core_type<tc>} {
    %c0 = arith.constant 0 : index
    %c0_0 = arith.constant 0 : index
    %0 = vector.load %arg0[%c0, %c0_0] : memref<64x128xbf16, #tpu.memory_space<vmem>>, vector<64x128xbf16>
    %c0_1 = arith.constant 0 : index
    %c0_2 = arith.constant 0 : index
    %1 = vector.load %arg1[%c0_1, %c0_2] : memref<128x384xbf16, #tpu.memory_space<vmem>>, vector<128x384xbf16>
    %cst = arith.constant dense<0.000000e+00> : vector<64x384xf32>
    %2 = tpu.matmul %0, %1, %cst {dimension_numbers = #tpu.dot_dimension_numbers<[1], [0], [0], [1], [0, 0, 1, 1], [], []>} : vector<64x128xbf16>, vector<128x384xbf16>, vector<64x384xf32> -> vector<64x384xf32>
    %c0_3 = arith.constant 0 : index
    %c0_4 = arith.constant 0 : index
    %3 = vector.load %arg3[%c0_3, %c0_4] : memref<1x384xf32, #tpu.memory_space<vmem>>, vector<1x384xf32>
    %4 = vector.broadcast %3 : vector<1x384xf32> to vector<64x384xf32>
    %5 = arith.addf %2, %4 : vector<64x384xf32>
    %c0_5 = arith.constant 0 : index
    %c0_6 = arith.constant 0 : index
    %6 = vector.load %arg6[%c0_5, %c0_6] : memref<64x384xf32, #tpu.memory_space<vmem>>, vector<64x384xf32>
    tpu.vector_store %arg6[%c0_5, %c0_6], %5 {strides = array<i32>} : memref<64x384xf32, #tpu.memory_space<vmem>>, vector<64x384xf32>,
    %c0_7 = arith.constant 0 : index
    %c0_8 = arith.constant 0 : index
    %7 = vector.load %arg2[%c0_7, %c0_8] : memref<128x384xbf16, #tpu.memory_space<vmem>>, vector<128x384xbf16>
    %c0_9 = arith.constant 0 : index
    %c0_10 = arith.constant 0 : index
    %8 = vector.load %arg4[%c0_9, %c0_10] : memref<1x384xf32, #tpu.memory_space<vmem>>, vector<1x384xf32>
    %cst_11 = arith.constant 0.000000e+00 : f32
    %9 = vector.broadcast %cst_11 : f32 to vector<8x128xf32>
    %c0_i32 = arith.constant 0 : i32
    %10 = arith.truncf %9 : vector<8x128xf32> to vector<8x128xbf16>
    %cst_12 = arith.constant dense<0.000000e+00> : vector<8x384xf32>
    %11 = tpu.matmul %10, %7, %cst_12 {dimension_numbers = #tpu.dot_dimension_numbers<[1], [0], [0], [1], [0, 0, 1, 1], [], []>} : vector<8x128xbf16>, vector<128x384xbf16>, vector<8x384xf32> -> vector<8x384xf32>
    %12 = vector.broadcast %8 : vector<1x384xf32> to vector<8x384xf32>
    %13 = arith.addf %11, %12 : vector<8x384xf32>
    %c8_i32 = arith.constant 8 : i32
    %14 = arith.muli %c0_i32, %c8_i32 : i32
    %15 = tpu.assume_multiple %14, 8 : i32
    %16 = arith.index_cast %15 : i32 to index
    %c0_13 = arith.constant 0 : index
    %17 = vector.load %arg6[%16, %c0_13] : memref<64x384xf32, #tpu.memory_space<vmem>>, vector<8x384xf32>
    %18 = vector.extract_strided_slice %17 {offsets = [0, 0], sizes = [8, 128], strides = [1, 1]} : vector<8x384xf32> to vector<8x128xf32>
    %19 = vector.extract_strided_slice %13 {offsets = [0, 0], sizes = [8, 128], strides = [1, 1]} : vector<8x384xf32> to vector<8x128xf32>
    %20 = arith.addf %18, %19 : vector<8x128xf32>
    %21 = arith.negf %20 : vector<8x128xf32>
    %22 = math.exp %21 : vector<8x128xf32>
    %cst_14 = arith.constant 1.000000e+00 : f32
    %23 = vector.broadcast %cst_14 : f32 to vector<8x128xf32>
    %24 = arith.addf %23, %22 : vector<8x128xf32>
    %25 = arith.divf %23, %24 : vector<8x128xf32>
    %26 = vector.extract_strided_slice %17 {offsets = [0, 128], sizes = [8, 128], strides = [1, 1]} : vector<8x384xf32> to vector<8x128xf32>
    %27 = vector.extract_strided_slice %13 {offsets = [0, 128], sizes = [8, 128], strides = [1, 1]} : vector<8x384xf32> to vector<8x128xf32>
    %28 = arith.addf %26, %27 : vector<8x128xf32>
    %29 = arith.negf %28 : vector<8x128xf32>
    %30 = math.exp %29 : vector<8x128xf32>
    %cst_15 = arith.constant 1.000000e+00 : f32
    %31 = vector.broadcast %cst_15 : f32 to vector<8x128xf32>
    %32 = arith.addf %31, %30 : vector<8x128xf32>
    %33 = arith.divf %31, %32 : vector<8x128xf32>
    %34 = vector.extract_strided_slice %17 {offsets = [0, 256], sizes = [8, 128], strides = [1, 1]} : vector<8x384xf32> to vector<8x128xf32>
    %35 = vector.extract_strided_slice %13 {offsets = [0, 256], sizes = [8, 128], strides = [1, 1]} : vector<8x384xf32> to vector<8x128xf32>
    %36 = arith.mulf %25, %35 : vector<8x128xf32>
    %37 = arith.addf %34, %36 : vector<8x128xf32>
    %38 = math.tanh %37 : vector<8x128xf32>
    %cst_16 = arith.constant 1.000000e+00 : f32
    %39 = vector.broadcast %cst_16 : f32 to vector<8x128xf32>
    %40 = arith.subf %39, %33 : vector<8x128xf32>
    %41 = arith.mulf %40, %38 : vector<8x128xf32>
    %42 = arith.mulf %33, %9 : vector<8x128xf32>
    %43 = arith.addf %41, %42 : vector<8x128xf32>
    %c1_i32 = arith.constant 1 : i32
    %44 = arith.truncf %43 : vector<8x128xf32> to vector<8x128xbf16>
    %cst_17 = arith.constant dense<0.000000e+00> : vector<8x384xf32>
    %45 = tpu.matmul %44, %7, %cst_17 {dimension_numbers = #tpu.dot_dimension_numbers<[1], [0], [0], [1], [0, 0, 1, 1], [], []>} : vector<8x128xbf16>, vector<128x384xbf16>, vector<8x384xf32> -> vector<8x384xf32>
    %46 = vector.broadcast %8 : vector<1x384xf32> to vector<8x384xf32>
    %47 = arith.addf %45, %46 : vector<8x384xf32>
    %c8_i32_18 = arith.constant 8 : i32
    %48 = arith.muli %c1_i32, %c8_i32_18 : i32
    %49 = tpu.assume_multiple %48, 8 : i32
    %50 = arith.index_cast %49 : i32 to index
    %c0_19 = arith.constant 0 : index
    %51 = vector.load %arg6[%50, %c0_19] : memref<64x384xf32, #tpu.memory_space<vmem>>, vector<8x384xf32>
    %52 = vector.extract_strided_slice %51 {offsets = [0, 0], sizes = [8, 128], strides = [1, 1]} : vector<8x384xf32> to vector<8x128xf32>
    %53 = vector.extract_strided_slice %47 {offsets = [0, 0], sizes = [8, 128], strides = [1, 1]} : vector<8x384xf32> to vector<8x128xf32>
    %54 = arith.addf %52, %53 : vector<8x128xf32>
    %55 = arith.negf %54 : vector<8x128xf32>
    %56 = math.exp %55 : vector<8x128xf32>
    %cst_20 = arith.constant 1.000000e+00 : f32
    %57 = vector.broadcast %cst_20 : f32 to vector<8x128xf32>
    %58 = arith.addf %57, %56 : vector<8x128xf32>
    %59 = arith.divf %57, %58 : vector<8x128xf32>
    %60 = vector.extract_strided_slice %51 {offsets = [0, 128], sizes = [8, 128], strides = [1, 1]} : vector<8x384xf32> to vector<8x128xf32>
    %61 = vector.extract_strided_slice %47 {offsets = [0, 128], sizes = [8, 128], strides = [1, 1]} : vector<8x384xf32> to vector<8x128xf32>
    %62 = arith.addf %60, %61 : vector<8x128xf32>
    %63 = arith.negf %62 : vector<8x128xf32>
    %64 = math.exp %63 : vector<8x128xf32>
    %cst_21 = arith.constant 1.000000e+00 : f32
    %65 = vector.broadcast %cst_21 : f32 to vector<8x128xf32>
    %66 = arith.addf %65, %64 : vector<8x128xf32>
    %67 = arith.divf %65, %66 : vector<8x128xf32>
    %68 = vector.extract_strided_slice %51 {offsets = [0, 256], sizes = [8, 128], strides = [1, 1]} : vector<8x384xf32> to vector<8x128xf32>
    %69 = vector.extract_strided_slice %47 {offsets = [0, 256], sizes = [8, 128], strides = [1, 1]} : vector<8x384xf32> to vector<8x128xf32>
    %70 = arith.mulf %59, %69 : vector<8x128xf32>
    %71 = arith.addf %68, %70 : vector<8x128xf32>
    %72 = math.tanh %71 : vector<8x128xf32>
    %cst_22 = arith.constant 1.000000e+00 : f32
    %73 = vector.broadcast %cst_22 : f32 to vector<8x128xf32>
    %74 = arith.subf %73, %67 : vector<8x128xf32>
    %75 = arith.mulf %74, %72 : vector<8x128xf32>
    %76 = arith.mulf %67, %43 : vector<8x128xf32>
    %77 = arith.addf %75, %76 : vector<8x128xf32>
    %c2_i32 = arith.constant 2 : i32
    %78 = arith.truncf %77 : vector<8x128xf32> to vector<8x128xbf16>
    %cst_23 = arith.constant dense<0.000000e+00> : vector<8x384xf32>
    %79 = tpu.matmul %78, %7, %cst_23 {dimension_numbers = #tpu.dot_dimension_numbers<[1], [0], [0], [1], [0, 0, 1, 1], [], []>} : vector<8x128xbf16>, vector<128x384xbf16>, vector<8x384xf32> -> vector<8x384xf32>
    %80 = vector.broadcast %8 : vector<1x384xf32> to vector<8x384xf32>
    %81 = arith.addf %79, %80 : vector<8x384xf32>
    %c8_i32_24 = arith.constant 8 : i32
    %82 = arith.muli %c2_i32, %c8_i32_24 : i32
    %83 = tpu.assume_multiple %82, 8 : i32
    %84 = arith.index_cast %83 : i32 to index
    %c0_25 = arith.constant 0 : index
    %85 = vector.load %arg6[%84, %c0_25] : memref<64x384xf32, #tpu.memory_space<vmem>>, vector<8x384xf32>
    %86 = vector.extract_strided_slice %85 {offsets = [0, 0], sizes = [8, 128], strides = [1, 1]} : vector<8x384xf32> to vector<8x128xf32>
    %87 = vector.extract_strided_slice %81 {offsets = [0, 0], sizes = [8, 128], strides = [1, 1]} : vector<8x384xf32> to vector<8x128xf32>
    %88 = arith.addf %86, %87 : vector<8x128xf32>
    %89 = arith.negf %88 : vector<8x128xf32>
    %90 = math.exp %89 : vector<8x128xf32>
    %cst_26 = arith.constant 1.000000e+00 : f32
    %91 = vector.broadcast %cst_26 : f32 to vector<8x128xf32>
    %92 = arith.addf %91, %90 : vector<8x128xf32>
    %93 = arith.divf %91, %92 : vector<8x128xf32>
    %94 = vector.extract_strided_slice %85 {offsets = [0, 128], sizes = [8, 128], strides = [1, 1]} : vector<8x384xf32> to vector<8x128xf32>
    %95 = vector.extract_strided_slice %81 {offsets = [0, 128], sizes = [8, 128], strides = [1, 1]} : vector<8x384xf32> to vector<8x128xf32>
    %96 = arith.addf %94, %95 : vector<8x128xf32>
    %97 = arith.negf %96 : vector<8x128xf32>
    %98 = math.exp %97 : vector<8x128xf32>
    %cst_27 = arith.constant 1.000000e+00 : f32
    %99 = vector.broadcast %cst_27 : f32 to vector<8x128xf32>
    %100 = arith.addf %99, %98 : vector<8x128xf32>
    %101 = arith.divf %99, %100 : vector<8x128xf32>
    %102 = vector.extract_strided_slice %85 {offsets = [0, 256], sizes = [8, 128], strides = [1, 1]} : vector<8x384xf32> to vector<8x128xf32>
    %103 = vector.extract_strided_slice %81 {offsets = [0, 256], sizes = [8, 128], strides = [1, 1]} : vector<8x384xf32> to vector<8x128xf32>
    %104 = arith.mulf %93, %103 : vector<8x128xf32>
    %105 = arith.addf %102, %104 : vector<8x128xf32>
    %106 = math.tanh %105 : vector<8x128xf32>
    %cst_28 = arith.constant 1.000000e+00 : f32
    %107 = vector.broadcast %cst_28 : f32 to vector<8x128xf32>
    %108 = arith.subf %107, %101 : vector<8x128xf32>
    %109 = arith.mulf %108, %106 : vector<8x128xf32>
    %110 = arith.mulf %101, %77 : vector<8x128xf32>
    %111 = arith.addf %109, %110 : vector<8x128xf32>
    %c3_i32 = arith.constant 3 : i32
    %112 = arith.truncf %111 : vector<8x128xf32> to vector<8x128xbf16>
    %cst_29 = arith.constant dense<0.000000e+00> : vector<8x384xf32>
    %113 = tpu.matmul %112, %7, %cst_29 {dimension_numbers = #tpu.dot_dimension_numbers<[1], [0], [0], [1], [0, 0, 1, 1], [], []>} : vector<8x128xbf16>, vector<128x384xbf16>, vector<8x384xf32> -> vector<8x384xf32>
    %114 = vector.broadcast %8 : vector<1x384xf32> to vector<8x384xf32>
    %115 = arith.addf %113, %114 : vector<8x384xf32>
    %c8_i32_30 = arith.constant 8 : i32
    %116 = arith.muli %c3_i32, %c8_i32_30 : i32
    %117 = tpu.assume_multiple %116, 8 : i32
    %118 = arith.index_cast %117 : i32 to index
    %c0_31 = arith.constant 0 : index
    %119 = vector.load %arg6[%118, %c0_31] : memref<64x384xf32, #tpu.memory_space<vmem>>, vector<8x384xf32>
    %120 = vector.extract_strided_slice %119 {offsets = [0, 0], sizes = [8, 128], strides = [1, 1]} : vector<8x384xf32> to vector<8x128xf32>
    %121 = vector.extract_strided_slice %115 {offsets = [0, 0], sizes = [8, 128], strides = [1, 1]} : vector<8x384xf32> to vector<8x128xf32>
    %122 = arith.addf %120, %121 : vector<8x128xf32>
    %123 = arith.negf %122 : vector<8x128xf32>
    %124 = math.exp %123 : vector<8x128xf32>
    %cst_32 = arith.constant 1.000000e+00 : f32
    %125 = vector.broadcast %cst_32 : f32 to vector<8x128xf32>
    %126 = arith.addf %125, %124 : vector<8x128xf32>
    %127 = arith.divf %125, %126 : vector<8x128xf32>
    %128 = vector.extract_strided_slice %119 {offsets = [0, 128], sizes = [8, 128], strides = [1, 1]} : vector<8x384xf32> to vector<8x128xf32>
    %129 = vector.extract_strided_slice %115 {offsets = [0, 128], sizes = [8, 128], strides = [1, 1]} : vector<8x384xf32> to vector<8x128xf32>
    %130 = arith.addf %128, %129 : vector<8x128xf32>
    %131 = arith.negf %130 : vector<8x128xf32>
    %132 = math.exp %131 : vector<8x128xf32>
    %cst_33 = arith.constant 1.000000e+00 : f32
    %133 = vector.broadcast %cst_33 : f32 to vector<8x128xf32>
    %134 = arith.addf %133, %132 : vector<8x128xf32>
    %135 = arith.divf %133, %134 : vector<8x128xf32>
    %136 = vector.extract_strided_slice %119 {offsets = [0, 256], sizes = [8, 128], strides = [1, 1]} : vector<8x384xf32> to vector<8x128xf32>
    %137 = vector.extract_strided_slice %115 {offsets = [0, 256], sizes = [8, 128], strides = [1, 1]} : vector<8x384xf32> to vector<8x128xf32>
    %138 = arith.mulf %127, %137 : vector<8x128xf32>
    %139 = arith.addf %136, %138 : vector<8x128xf32>
    %140 = math.tanh %139 : vector<8x128xf32>
    %cst_34 = arith.constant 1.000000e+00 : f32
    %141 = vector.broadcast %cst_34 : f32 to vector<8x128xf32>
    %142 = arith.subf %141, %135 : vector<8x128xf32>
    %143 = arith.mulf %142, %140 : vector<8x128xf32>
    %144 = arith.mulf %135, %111 : vector<8x128xf32>
    %145 = arith.addf %143, %144 : vector<8x128xf32>
    %c4_i32 = arith.constant 4 : i32
    %146 = arith.truncf %145 : vector<8x128xf32> to vector<8x128xbf16>
    %cst_35 = arith.constant dense<0.000000e+00> : vector<8x384xf32>
    %147 = tpu.matmul %146, %7, %cst_35 {dimension_numbers = #tpu.dot_dimension_numbers<[1], [0], [0], [1], [0, 0, 1, 1], [], []>} : vector<8x128xbf16>, vector<128x384xbf16>, vector<8x384xf32> -> vector<8x384xf32>
    %148 = vector.broadcast %8 : vector<1x384xf32> to vector<8x384xf32>
    %149 = arith.addf %147, %148 : vector<8x384xf32>
    %c8_i32_36 = arith.constant 8 : i32
    %150 = arith.muli %c4_i32, %c8_i32_36 : i32
    %151 = tpu.assume_multiple %150, 8 : i32
    %152 = arith.index_cast %151 : i32 to index
    %c0_37 = arith.constant 0 : index
    %153 = vector.load %arg6[%152, %c0_37] : memref<64x384xf32, #tpu.memory_space<vmem>>, vector<8x384xf32>
    %154 = vector.extract_strided_slice %153 {offsets = [0, 0], sizes = [8, 128], strides = [1, 1]} : vector<8x384xf32> to vector<8x128xf32>
    %155 = vector.extract_strided_slice %149 {offsets = [0, 0], sizes = [8, 128], strides = [1, 1]} : vector<8x384xf32> to vector<8x128xf32>
    %156 = arith.addf %154, %155 : vector<8x128xf32>
    %157 = arith.negf %156 : vector<8x128xf32>
    %158 = math.exp %157 : vector<8x128xf32>
    %cst_38 = arith.constant 1.000000e+00 : f32
    %159 = vector.broadcast %cst_38 : f32 to vector<8x128xf32>
    %160 = arith.addf %159, %158 : vector<8x128xf32>
    %161 = arith.divf %159, %160 : vector<8x128xf32>
    %162 = vector.extract_strided_slice %153 {offsets = [0, 128], sizes = [8, 128], strides = [1, 1]} : vector<8x384xf32> to vector<8x128xf32>
    %163 = vector.extract_strided_slice %149 {offsets = [0, 128], sizes = [8, 128], strides = [1, 1]} : vector<8x384xf32> to vector<8x128xf32>
    %164 = arith.addf %162, %163 : vector<8x128xf32>
    %165 = arith.negf %164 : vector<8x128xf32>
    %166 = math.exp %165 : vector<8x128xf32>
    %cst_39 = arith.constant 1.000000e+00 : f32
    %167 = vector.broadcast %cst_39 : f32 to vector<8x128xf32>
    %168 = arith.addf %167, %166 : vector<8x128xf32>
    %169 = arith.divf %167, %168 : vector<8x128xf32>
    %170 = vector.extract_strided_slice %153 {offsets = [0, 256], sizes = [8, 128], strides = [1, 1]} : vector<8x384xf32> to vector<8x128xf32>
    %171 = vector.extract_strided_slice %149 {offsets = [0, 256], sizes = [8, 128], strides = [1, 1]} : vector<8x384xf32> to vector<8x128xf32>
    %172 = arith.mulf %161, %171 : vector<8x128xf32>
    %173 = arith.addf %170, %172 : vector<8x128xf32>
    %174 = math.tanh %173 : vector<8x128xf32>
    %cst_40 = arith.constant 1.000000e+00 : f32
    %175 = vector.broadcast %cst_40 : f32 to vector<8x128xf32>
    %176 = arith.subf %175, %169 : vector<8x128xf32>
    %177 = arith.mulf %176, %174 : vector<8x128xf32>
    %178 = arith.mulf %169, %145 : vector<8x128xf32>
    %179 = arith.addf %177, %178 : vector<8x128xf32>
    %c5_i32 = arith.constant 5 : i32
    %180 = arith.truncf %179 : vector<8x128xf32> to vector<8x128xbf16>
    %cst_41 = arith.constant dense<0.000000e+00> : vector<8x384xf32>
    %181 = tpu.matmul %180, %7, %cst_41 {dimension_numbers = #tpu.dot_dimension_numbers<[1], [0], [0], [1], [0, 0, 1, 1], [], []>} : vector<8x128xbf16>, vector<128x384xbf16>, vector<8x384xf32> -> vector<8x384xf32>
    %182 = vector.broadcast %8 : vector<1x384xf32> to vector<8x384xf32>
    %183 = arith.addf %181, %182 : vector<8x384xf32>
    %c8_i32_42 = arith.constant 8 : i32
    %184 = arith.muli %c5_i32, %c8_i32_42 : i32
    %185 = tpu.assume_multiple %184, 8 : i32
    %186 = arith.index_cast %185 : i32 to index
    %c0_43 = arith.constant 0 : index
    %187 = vector.load %arg6[%186, %c0_43] : memref<64x384xf32, #tpu.memory_space<vmem>>, vector<8x384xf32>
    %188 = vector.extract_strided_slice %187 {offsets = [0, 0], sizes = [8, 128], strides = [1, 1]} : vector<8x384xf32> to vector<8x128xf32>
    %189 = vector.extract_strided_slice %183 {offsets = [0, 0], sizes = [8, 128], strides = [1, 1]} : vector<8x384xf32> to vector<8x128xf32>
    %190 = arith.addf %188, %189 : vector<8x128xf32>
    %191 = arith.negf %190 : vector<8x128xf32>
    %192 = math.exp %191 : vector<8x128xf32>
    %cst_44 = arith.constant 1.000000e+00 : f32
    %193 = vector.broadcast %cst_44 : f32 to vector<8x128xf32>
    %194 = arith.addf %193, %192 : vector<8x128xf32>
    %195 = arith.divf %193, %194 : vector<8x128xf32>
    %196 = vector.extract_strided_slice %187 {offsets = [0, 128], sizes = [8, 128], strides = [1, 1]} : vector<8x384xf32> to vector<8x128xf32>
    %197 = vector.extract_strided_slice %183 {offsets = [0, 128], sizes = [8, 128], strides = [1, 1]} : vector<8x384xf32> to vector<8x128xf32>
    %198 = arith.addf %196, %197 : vector<8x128xf32>
    %199 = arith.negf %198 : vector<8x128xf32>
    %200 = math.exp %199 : vector<8x128xf32>
    %cst_45 = arith.constant 1.000000e+00 : f32
    %201 = vector.broadcast %cst_45 : f32 to vector<8x128xf32>
    %202 = arith.addf %201, %200 : vector<8x128xf32>
    %203 = arith.divf %201, %202 : vector<8x128xf32>
    %204 = vector.extract_strided_slice %187 {offsets = [0, 256], sizes = [8, 128], strides = [1, 1]} : vector<8x384xf32> to vector<8x128xf32>
    %205 = vector.extract_strided_slice %183 {offsets = [0, 256], sizes = [8, 128], strides = [1, 1]} : vector<8x384xf32> to vector<8x128xf32>
    %206 = arith.mulf %195, %205 : vector<8x128xf32>
    %207 = arith.addf %204, %206 : vector<8x128xf32>
    %208 = math.tanh %207 : vector<8x128xf32>
    %cst_46 = arith.constant 1.000000e+00 : f32
    %209 = vector.broadcast %cst_46 : f32 to vector<8x128xf32>
    %210 = arith.subf %209, %203 : vector<8x128xf32>
    %211 = arith.mulf %210, %208 : vector<8x128xf32>
    %212 = arith.mulf %203, %179 : vector<8x128xf32>
    %213 = arith.addf %211, %212 : vector<8x128xf32>
    %c6_i32 = arith.constant 6 : i32
    %214 = arith.truncf %213 : vector<8x128xf32> to vector<8x128xbf16>
    %cst_47 = arith.constant dense<0.000000e+00> : vector<8x384xf32>
    %215 = tpu.matmul %214, %7, %cst_47 {dimension_numbers = #tpu.dot_dimension_numbers<[1], [0], [0], [1], [0, 0, 1, 1], [], []>} : vector<8x128xbf16>, vector<128x384xbf16>, vector<8x384xf32> -> vector<8x384xf32>
    %216 = vector.broadcast %8 : vector<1x384xf32> to vector<8x384xf32>
    %217 = arith.addf %215, %216 : vector<8x384xf32>
    %c8_i32_48 = arith.constant 8 : i32
    %218 = arith.muli %c6_i32, %c8_i32_48 : i32
    %219 = tpu.assume_multiple %218, 8 : i32
    %220 = arith.index_cast %219 : i32 to index
    %c0_49 = arith.constant 0 : index
    %221 = vector.load %arg6[%220, %c0_49] : memref<64x384xf32, #tpu.memory_space<vmem>>, vector<8x384xf32>
    %222 = vector.extract_strided_slice %221 {offsets = [0, 0], sizes = [8, 128], strides = [1, 1]} : vector<8x384xf32> to vector<8x128xf32>
    %223 = vector.extract_strided_slice %217 {offsets = [0, 0], sizes = [8, 128], strides = [1, 1]} : vector<8x384xf32> to vector<8x128xf32>
    %224 = arith.addf %222, %223 : vector<8x128xf32>
    %225 = arith.negf %224 : vector<8x128xf32>
    %226 = math.exp %225 : vector<8x128xf32>
    %cst_50 = arith.constant 1.000000e+00 : f32
    %227 = vector.broadcast %cst_50 : f32 to vector<8x128xf32>
    %228 = arith.addf %227, %226 : vector<8x128xf32>
    %229 = arith.divf %227, %228 : vector<8x128xf32>
    %230 = vector.extract_strided_slice %221 {offsets = [0, 128], sizes = [8, 128], strides = [1, 1]} : vector<8x384xf32> to vector<8x128xf32>
    %231 = vector.extract_strided_slice %217 {offsets = [0, 128], sizes = [8, 128], strides = [1, 1]} : vector<8x384xf32> to vector<8x128xf32>
    %232 = arith.addf %230, %231 : vector<8x128xf32>
    %233 = arith.negf %232 : vector<8x128xf32>
    %234 = math.exp %233 : vector<8x128xf32>
    %cst_51 = arith.constant 1.000000e+00 : f32
    %235 = vector.broadcast %cst_51 : f32 to vector<8x128xf32>
    %236 = arith.addf %235, %234 : vector<8x128xf32>
    %237 = arith.divf %235, %236 : vector<8x128xf32>
    %238 = vector.extract_strided_slice %221 {offsets = [0, 256], sizes = [8, 128], strides = [1, 1]} : vector<8x384xf32> to vector<8x128xf32>
    %239 = vector.extract_strided_slice %217 {offsets = [0, 256], sizes = [8, 128], strides = [1, 1]} : vector<8x384xf32> to vector<8x128xf32>
    %240 = arith.mulf %229, %239 : vector<8x128xf32>
    %241 = arith.addf %238, %240 : vector<8x128xf32>
    %242 = math.tanh %241 : vector<8x128xf32>
    %cst_52 = arith.constant 1.000000e+00 : f32
    %243 = vector.broadcast %cst_52 : f32 to vector<8x128xf32>
    %244 = arith.subf %243, %237 : vector<8x128xf32>
    %245 = arith.mulf %244, %242 : vector<8x128xf32>
    %246 = arith.mulf %237, %213 : vector<8x128xf32>
    %247 = arith.addf %245, %246 : vector<8x128xf32>
    %c7_i32 = arith.constant 7 : i32
    %248 = arith.truncf %247 : vector<8x128xf32> to vector<8x128xbf16>
    %cst_53 = arith.constant dense<0.000000e+00> : vector<8x384xf32>
    %249 = tpu.matmul %248, %7, %cst_53 {dimension_numbers = #tpu.dot_dimension_numbers<[1], [0], [0], [1], [0, 0, 1, 1], [], []>} : vector<8x128xbf16>, vector<128x384xbf16>, vector<8x384xf32> -> vector<8x384xf32>
    %250 = vector.broadcast %8 : vector<1x384xf32> to vector<8x384xf32>
    %251 = arith.addf %249, %250 : vector<8x384xf32>
    %c8_i32_54 = arith.constant 8 : i32
    %252 = arith.muli %c7_i32, %c8_i32_54 : i32
    %253 = tpu.assume_multiple %252, 8 : i32
    %254 = arith.index_cast %253 : i32 to index
    %c0_55 = arith.constant 0 : index
    %255 = vector.load %arg6[%254, %c0_55] : memref<64x384xf32, #tpu.memory_space<vmem>>, vector<8x384xf32>
    %256 = vector.extract_strided_slice %255 {offsets = [0, 0], sizes = [8, 128], strides = [1, 1]} : vector<8x384xf32> to vector<8x128xf32>
    %257 = vector.extract_strided_slice %251 {offsets = [0, 0], sizes = [8, 128], strides = [1, 1]} : vector<8x384xf32> to vector<8x128xf32>
    %258 = arith.addf %256, %257 : vector<8x128xf32>
    %259 = arith.negf %258 : vector<8x128xf32>
    %260 = math.exp %259 : vector<8x128xf32>
    %cst_56 = arith.constant 1.000000e+00 : f32
    %261 = vector.broadcast %cst_56 : f32 to vector<8x128xf32>
    %262 = arith.addf %261, %260 : vector<8x128xf32>
    %263 = arith.divf %261, %262 : vector<8x128xf32>
    %264 = vector.extract_strided_slice %255 {offsets = [0, 128], sizes = [8, 128], strides = [1, 1]} : vector<8x384xf32> to vector<8x128xf32>
    %265 = vector.extract_strided_slice %251 {offsets = [0, 128], sizes = [8, 128], strides = [1, 1]} : vector<8x384xf32> to vector<8x128xf32>
    %266 = arith.addf %264, %265 : vector<8x128xf32>
    %267 = arith.negf %266 : vector<8x128xf32>
    %268 = math.exp %267 : vector<8x128xf32>
    %cst_57 = arith.constant 1.000000e+00 : f32
    %269 = vector.broadcast %cst_57 : f32 to vector<8x128xf32>
    %270 = arith.addf %269, %268 : vector<8x128xf32>
    %271 = arith.divf %269, %270 : vector<8x128xf32>
    %272 = vector.extract_strided_slice %255 {offsets = [0, 256], sizes = [8, 128], strides = [1, 1]} : vector<8x384xf32> to vector<8x128xf32>
    %273 = vector.extract_strided_slice %251 {offsets = [0, 256], sizes = [8, 128], strides = [1, 1]} : vector<8x384xf32> to vector<8x128xf32>
    %274 = arith.mulf %263, %273 : vector<8x128xf32>
    %275 = arith.addf %272, %274 : vector<8x128xf32>
    %276 = math.tanh %275 : vector<8x128xf32>
    %cst_58 = arith.constant 1.000000e+00 : f32
    %277 = vector.broadcast %cst_58 : f32 to vector<8x128xf32>
    %278 = arith.subf %277, %271 : vector<8x128xf32>
    %279 = arith.mulf %278, %276 : vector<8x128xf32>
    %280 = arith.mulf %271, %247 : vector<8x128xf32>
    %281 = arith.addf %279, %280 : vector<8x128xf32>
    %c8_i32_59 = arith.constant 8 : i32
    %c0_60 = arith.constant 0 : index
    %c0_61 = arith.constant 0 : index
    %282 = vector.load %arg5[%c0_60, %c0_61] : memref<8x128xf32, #tpu.memory_space<vmem>>, vector<8x128xf32>
    tpu.vector_store %arg5[%c0_60, %c0_61], %281 {strides = array<i32>} : memref<8x128xf32, #tpu.memory_space<vmem>>, vector<8x128xf32>,
    return
  }
}

</mosaic_0001>

<bundles_post_ra>
// kernel: tpu_custom_call.1
= control target key start
LH: loop header
LB: loop body
LE: loop exit
PB: predicated region body
PF: predicated region fallthrough
CT: control target
= control target key end

     0   :  { %10 = vsyncpa [#allocation4], 0  ;;  %s2675_s0 = inlined_call_operand.hbm [shape: bf16[64,128], index: 0, kind: input, shape index: {}]   ;;  %s2676_s1 = inlined_call_operand.hbm [shape: bf16[128,384], index: 1, kind: input, shape index: {}]   ;;  %s2677_s2 = inlined_call_operand.hbm [shape: bf16[128,384], index: 2, kind: input, shape index: {}]   ;;  %s2678_s3 = inlined_call_operand.vmem [shape: f32[1,384], index: 3, kind: input, shape index: {}]   ;;  %s2679_s4 = inlined_call_operand.vmem [shape: f32[1,384], index: 4, kind: input, shape index: {}]   ;;  %s2680_s5 = inlined_call_operand.hbm [shape: f32[8,128], index: 5, kind: output, shape index: {}]  }
   0x1   :  { %11 = vsyncpa [#allocation7], 0 }
   0x2   :  { %12 = vsyncpa [#allocation5], 0  ;;  %s2119_s18 = smov [#allocation6]   ;;  %s2025_s22 = scalar_lea.hbm %s2676_s1, 3072 }
   0x3   :  { %s30_s19 = sshll.u32 %s2119_s18, 4  ;;  %p2026_p0 = scmp.ne.s32.totalorder %s2676_s1, %s2025_s22  ;;  %s31_s19 = int_to_ptr.vmem [resolvable:$true] %s30_s19 }
   0x4   :  { %p2029_p1 = scmp.lt.u32.totalorder %s2025_s22, %s2676_s1 }
   0x6   :  { %p2031_p2 = pnand %p2029_p1, %p2026_p0 }
   0x8   :  { %2034 = shalt.err (!%p2031_p2)
}
   0x9   :  { %s2035_s27 = scalar_lea.vmem %s31_s19, 3072  ;;  %p2040_p4 = scmp.lt.s32.totalorder %s31_s19, %s31_s19 }
   0xa   :  { %p2036_p3 = scmp.ne.s32.totalorder %s31_s19, %s2035_s27  ;;  %p2041_p5 = scmp.lt.s32.totalorder %s2035_s27, %s2035_s27 }
   0xc   :  { %p2042_p6 = por %p2041_p5, %p2040_p4 }
   0xe   :  { %p2043_p7 = pnand %p2042_p6, %p2036_p3 }
  0x10   :  { %2046 = shalt.err (!%p2043_p7)
}
  0x11   :  { %s2120_s28 = smov 192   ;;  %s2121_s29 = smov 12  }
  0x12   :  { %36 = dma.hbm_to_vmem [thread:$0]  %s2676_s1, 3072, %s31_s19, [#allocation7], %s2120_s28, %s2120_s28, %s2121_s29  }
  0x13   :  { %s2122_s7 = smov [#allocation3]   ;;  %s2047_s11 = scalar_lea.hbm %s2675_s0, 512 }
  0x14   :  { %s18_s8 = sshll.u32 %s2122_s7, 4  ;;  %p2048_p8 = scmp.ne.s32.totalorder %s2675_s0, %s2047_s11  ;;  %s19_s8 = int_to_ptr.vmem [resolvable:$true] %s18_s8 }
  0x15   :  { %p2051_p9 = scmp.lt.u32.totalorder %s2047_s11, %s2675_s0 }
  0x17   :  { %p2053_p10 = pnand %p2051_p9, %p2048_p8 }
  0x19   :  { %2056 = shalt.err (!%p2053_p10)
}
  0x1a   :  { %s2057_s16 = scalar_lea.vmem %s19_s8, 512  ;;  %p2062_p12 = scmp.lt.s32.totalorder %s19_s8, %s19_s8 }
  0x1b   :  { %p2058_p11 = scmp.ne.s32.totalorder %s19_s8, %s2057_s16  ;;  %p2063_p13 = scmp.lt.s32.totalorder %s2057_s16, %s2057_s16 }
  0x1d   :  { %p2064_p0 = por %p2063_p13, %p2062_p12 }
  0x1f   :  { %p2065_p1 = pnand %p2064_p0, %p2058_p11 }
  0x21   :  { %2068 = shalt.err (!%p2065_p1)
}
  0x22   :  { %s2123_s1 = smov 64   ;;  %s2124_s17 = smov 4  }
  0x23   :  { %24 = dma.hbm_to_vmem [thread:$0]  %s2675_s0, 512, %s19_s8, [#allocation4], %s2123_s1, %s2123_s1, %s2124_s17  }
  0x24   :  { %s2125_s20 = smov [#allocation8]   ;;  %s2069_s24 = scalar_lea.hbm %s2677_s2, 3072 }
  0x25   :  { %s42_s21 = sshll.u32 %s2125_s20, 4  ;;  %p2070_p2 = scmp.ne.s32.totalorder %s2677_s2, %s2069_s24  ;;  %s43_s21 = int_to_ptr.vmem [resolvable:$true] %s42_s21 }
  0x26   :  { %p2073_p3 = scmp.lt.u32.totalorder %s2069_s24, %s2677_s2 }
  0x28   :  { %p2075_p4 = pnand %p2073_p3, %p2070_p2 }
  0x2a   :  { %2078 = shalt.err (!%p2075_p4)
}
  0x2b   :  { %s2079_s6 = scalar_lea.vmem %s43_s21, 3072  ;;  %p2084_p6 = scmp.lt.s32.totalorder %s43_s21, %s43_s21 }
  0x2c   :  { %p2080_p5 = scmp.ne.s32.totalorder %s43_s21, %s2079_s6  ;;  %p2085_p7 = scmp.lt.s32.totalorder %s2079_s6, %s2079_s6 }
  0x2e   :  { %p2086_p8 = por %p2085_p7, %p2084_p6 }
  0x30   :  { %p2087_p9 = pnand %p2086_p8, %p2080_p5 }
  0x32   :  { %2090 = shalt.err (!%p2087_p9)
}
  0x33   :  { %48 = dma.hbm_to_vmem [thread:$0]  %s2677_s2, 3072, %s43_s21, [#allocation7], %s2120_s28, %s2120_s28, %s2121_s29  }
  0x34   :  { %2113 = dma.done.wait [#allocation4], 512  }
  0x35   :  { %2114 = vsyncadd [#allocation4], 4294966784 }
  0x36   :  { %2115 = dma.done.wait [#allocation7], 6144  }
  0x37   :  { %2116 = vsyncadd [#allocation7], 4294961152  ;;  %v2681_v0 = vmov 0   ;;  %v1853_v1 = vld [vmem:[#allocation6 + $0x4] ss:$12 sps:$4 sm:$0xff]   ;;  %v1888_v31 = vld [vmem:[#allocation3 + $0x8] sm:$0xff]   ;;  %v105_v54 = vlaneseq }
  0x38   :  { %304 = vmatprep.mubr.bf16.mxu0 %v2681_v0  ;;  %v1855_v2 = vld [vmem:[#allocation6] ss:$12 sps:$4 sm:$0xff]   ;;  %272 = vmatprep.subr.bf16.mxu0 %v1853_v1  ;;  %v1856_v3 = vld [vmem:[#allocation6 + $0x1c] ss:$12 sps:$4 sm:$0xff]   ;;  %v1858_v4 = vld [vmem:[#allocation6 + $0x18] ss:$12 sps:$4 sm:$0xff]  }
  0x39   :  { %273 = vmatpush1.bf16.msra.mxu0 %v1855_v2  ;;  %v1859_v5 = vld [vmem:[#allocation6 + $0x34] ss:$12 sps:$4 sm:$0xff]   ;;  %v1861_v6 = vld [vmem:[#allocation6 + $0x30] ss:$12 sps:$4 sm:$0xff]   ;;  %v1862_v7 = vld [vmem:[#allocation6 + $0x4c] ss:$12 sps:$4 sm:$0xff]  }
  0x3a   :  { %274 = vmatprep.subr.bf16.mxu0 %v1856_v3  ;;  %v1874_v8 = vld [vmem:[#allocation6 + $0x8] ss:$12 sps:$4 sm:$0xff]   ;;  %v1865_v10 = vld [vmem:[#allocation6 + $0x64] ss:$12 sps:$4 sm:$0xff]   ;;  %v1878_v11 = vld [vmem:[#allocation6 + $0x20] ss:$12 sps:$4 sm:$0xff]  }
  0x3b   :  { %v1864_v9 = vld [vmem:[#allocation6 + $0x48] ss:$12 sps:$4 sm:$0xff]   ;;  %1658 = vmatprep.subr.bf16.mxu1 %v1874_v8  ;;  %v1879_v12 = vld [vmem:[#allocation3] sm:$0xff]   ;;  %v1887_v16 = vld [vmem:[#allocation6 + $0x50] ss:$12 sps:$4 sm:$0xff]   ;;  %v2683_v35 = vmov 0.0  }
  0x3c   :  { %1659 = vmatpush3.bf16.msra.mxu1 %v1874_v8  ;;  %v1867_v13 = vld [vmem:[#allocation6 + $0x60] ss:$12 sps:$4 sm:$0xff]   ;;  %v1883_v14 = vld [vmem:[#allocation6 + $0x38] ss:$12 sps:$4 sm:$0xff]   ;;  %1674 = vmatprep.mubr.bf16.mxu1 %v1879_v12  ;;  %v1868_v15 = vld [vmem:[#allocation6 + $0x7c] ss:$12 sps:$4 sm:$0xff]  }
  0x3d   :  { %275 = vmatpush1.bf16.msra.mxu0 %v1858_v4  ;;  %1660 = vmatprep.subr.bf16.mxu1 %v1878_v11  ;;  %v1870_v17 = vld [vmem:[#allocation6 + $0x78] ss:$12 sps:$4 sm:$0xff]   ;;  %v1871_v18 = vld [vmem:[#allocation6 + $0x94] ss:$12 sps:$4 sm:$0xff]   ;;  %v1873_v20 = vld [vmem:[#allocation6 + $0x90] ss:$12 sps:$4 sm:$0xff]  }
  0x3e   :  { %276 = vmatprep.subr.bf16.mxu0 %v1859_v5  ;;  %v1892_v19 = vld [vmem:[#allocation6 + $0x68] ss:$12 sps:$4 sm:$0xff]   ;;  %v1875_v21 = vld [vmem:[#allocation6 + $0xac] ss:$12 sps:$4 sm:$0xff]   ;;  %v2203_v24 = vld [vmem:[#allocation8 + $0x4] ss:$12 sps:$4 sm:$0xff]  }
  0x3f   :  { %v1896_v22 = vld [vmem:[#allocation6 + $0x80] ss:$12 sps:$4 sm:$0xff]   ;;  %v1877_v23 = vld [vmem:[#allocation6 + $0xa8] ss:$12 sps:$4 sm:$0xff]   ;;  %v1901_v25 = vld [vmem:[#allocation6 + $0x98] ss:$12 sps:$4 sm:$0xff]  }
  0x40   :  { %1661 = vmatpush3.bf16.msra.mxu1 %v1878_v11  ;;  %v2205_v26 = vld [vmem:[#allocation8] ss:$12 sps:$4 sm:$0xff]   ;;  %v2208_v27 = vld [vmem:[#allocation8 + $0x1c] ss:$12 sps:$4 sm:$0xff]   ;;  %v2211_v29 = vld [vmem:[#allocation8 + $0x18] ss:$12 sps:$4 sm:$0xff]  }
  0x41   :  { %277 = vmatpush1.bf16.msra.mxu0 %v1861_v6  ;;  %1662 = vmatprep.subr.bf16.mxu1 %v1883_v14  ;;  %v1905_v28 = vld [vmem:[#allocation6 + $0xb0] ss:$12 sps:$4 sm:$0xff]   ;;  %v2215_v30 = vld [vmem:[#allocation8 + $0x34] ss:$12 sps:$4 sm:$0xff]   ;;  %v2221_v33 = vld [vmem:[#allocation8 + $0x4c] ss:$12 sps:$4 sm:$0xff]  }
  0x42   :  { %278 = vmatprep.subr.bf16.mxu0 %v1862_v7  ;;  %v2218_v32 = vld [vmem:[#allocation8 + $0x30] ss:$12 sps:$4 sm:$0xff]   ;;  %v2223_v34 = vld [vmem:[#allocation8 + $0x8] ss:$12 sps:$4 sm:$0xff]   ;;  %v2234_v39 = vld [vmem:[#allocation8 + $0x20] ss:$12 sps:$4 sm:$0xff]  }
  0x43   :  { %v2227_v36 = vld [vmem:[#allocation8 + $0x48] ss:$12 sps:$4 sm:$0xff]   ;;  %v2231_v38 = vld [vmem:[#allocation8 + $0x64] ss:$12 sps:$4 sm:$0xff]   ;;  %v2238_v40 = vld [vmem:[#allocation8 + $0x60] ss:$12 sps:$4 sm:$0xff]  }
  0x44   :  { %1663 = vmatpush3.bf16.msra.mxu1 %v1883_v14  ;;  %v1897_v37 = vld [vmem:[#allocation3 + $0x10] sm:$0xff]   ;;  %v2241_v41 = vld [vmem:[#allocation8 + $0x7c] ss:$12 sps:$4 sm:$0xff]   ;;  %v2244_v42 = vld [vmem:[#allocation8 + $0x38] ss:$12 sps:$4 sm:$0xff]   ;;  %vm2128_vm0 = vmmov 0  }
  0x45   :  { %279 = vmatpush1.bf16.msra.mxu0 %v1864_v9  ;;  %1664 = vmatprep.subr.bf16.mxu1 %v1887_v16  ;;  %v1906_v43 = vld [vmem:[#allocation3 + $0x18] sm:$0xff]   ;;  %v2252_v45 = vld [vmem:[#allocation8 + $0x94] ss:$12 sps:$4 sm:$0xff]   ;;  %v2328_v55 = vshrl.u32 %v105_v54, 7 }
  0x46   :  { %280 = vmatprep.subr.bf16.mxu0 %v1865_v10  ;;  %v2248_v44 = vld [vmem:[#allocation8 + $0x78] ss:$12 sps:$4 sm:$0xff]   ;;  %v2255_v46 = vld [vmem:[#allocation8 + $0x50] ss:$12 sps:$4 sm:$0xff]   ;;  %v2267_v49 = vld [vmem:[#allocation8 + $0x68] ss:$12 sps:$4 sm:$0xff]  }
  0x47   :  { %v2261_v47 = vld [vmem:[#allocation8 + $0x90] ss:$12 sps:$4 sm:$0xff]   ;;  %v2264_v48 = vld [vmem:[#allocation8 + $0xac] ss:$12 sps:$4 sm:$0xff]   ;;  %v2271_v50 = vld [vmem:[#allocation8 + $0xa8] ss:$12 sps:$4 sm:$0xff]  }
  0x48   :  { %1665 = vmatpush3.bf16.msra.mxu1 %v1887_v16  ;;  %v2276_v51 = vld [vmem:[#allocation8 + $0x80] ss:$12 sps:$4 sm:$0xff]   ;;  %v2282_v52 = vld [vmem:[#allocation8 + $0x98] ss:$12 sps:$4 sm:$0xff]   ;;  %v2290_v53 = vld [vmem:[#allocation8 + $0xb0] ss:$12 sps:$4 sm:$0xff]  }
  0x49   :  { %281 = vmatpush1.bf16.msra.mxu0 %v1867_v13  ;;  %1666 = vmatprep.subr.bf16.mxu1 %v1892_v19  ;;  %v107_v56 = vsub.s32 0, %v2328_v55  ;;  %v103_v57 = vld [vmem:[%s2678_s3] sm:$0x7]  ;;  %v111_v58 = vsub.s32 1, %v2328_v55  ;;  %v2685_v3 = vsub.s32 2, %v2328_v55 }
  0x4a   :  { %282 = vmatprep.subr.bf16.mxu0 %v1868_v15 }
  0x4b   :  { %v108_v60 = vrot.slane %v103_v57, %v107_v56  ;;  %v112_v62 = vrot.slane %v103_v57, %v111_v58  ;;  %v2342_v5 = vrot.slane %v103_v57, %v2685_v3 }
  0x4c   :  { %1667 = vmatpush3.bf16.msra.mxu1 %v1892_v19 }
  0x4d   :  { %283 = vmatpush1.bf16.msra.mxu0 %v1870_v17  ;;  %1668 = vmatprep.subr.bf16.mxu1 %v1896_v22 }
  0x4e   :  { %284 = vmatprep.subr.bf16.mxu0 %v1871_v18 }
  0x50   :  { %1669 = vmatpush3.bf16.msra.mxu1 %v1896_v22 }
  0x51   :  { %285 = vmatpush1.bf16.msra.mxu0 %v1873_v20  ;;  %1670 = vmatprep.subr.bf16.mxu1 %v1901_v25 }
  0x52   :  { %286 = vmatprep.subr.bf16.mxu0 %v1875_v21 }
  0x54   :  { %1671 = vmatpush3.bf16.msra.mxu1 %v1901_v25 }
  0x55   :  { %287 = vmatpush1.bf16.msra.mxu0 %v1877_v23  ;;  %1672 = vmatprep.subr.bf16.mxu1 %v1905_v28 }
  0x56   :  { %611 = vmatprep.subr.bf16.mxu0 %v2203_v24 }
  0x58   :  { %305 = vmatmul.mubr.bf16.vlgmr.msra.gmra.mrb[0].mxu0 %v1879_v12  ;;  %1673 = vmatpush3.bf16.msra.mxu1 %v1905_v28 }
  0x59   :  { %612 = vmatpush1.bf16.msra.mxu0 %v2205_v26  ;;  %314 = vmatprep.mubr.bf16.mxu0 %v2681_v0 }
  0x5a   :  { %613 = vmatprep.subr.bf16.mxu0 %v2208_v27  ;;  %1682 = vmatprep.subr.bf16.mxu1 %v2683_v35 }
  0x5b   :  { %1675 = vmatmul.mubr.bf16.vlgmr.msra.gmra.mrb[0].mxu1 %v1888_v31 }
  0x5c   :  { %1683 = vmatpush3.bf16.msra.mxu1 %v2223_v34  ;;  %1678 = vmatprep.mubr.bf16.mxu1 %v1897_v37 }
  0x5d   :  { %614 = vmatpush1.bf16.msra.mxu0 %v2211_v29  ;;  %1684 = vmatprep.subr.bf16.mxu1 %v2683_v35 }
  0x5e   :  { %615 = vmatprep.subr.bf16.mxu0 %v2215_v30 }
  0x60   :  { %315 = vmatmul.mubr.bf16.gmra.mrb[4].mxu0 %v1888_v31  ;;  %1685 = vmatpush3.bf16.msra.mxu1 %v2234_v39 }
  0x61   :  { %616 = vmatpush1.bf16.msra.mxu0 %v2218_v32  ;;  %324 = vmatprep.mubr.bf16.mxu0 %v2681_v0 }
  0x62   :  { %617 = vmatprep.subr.bf16.mxu0 %v2221_v33  ;;  %1686 = vmatprep.subr.bf16.mxu1 %v2683_v35 }
  0x63   :  { %1679 = vmatmul.mubr.bf16.gmra.mrb[4].mxu1 %v1906_v43 }
  0x64   :  { %1687 = vmatpush3.bf16.msra.mxu1 %v2244_v42  ;;  %1698 = vmatprep.mubr.msk.bf16.mxu1 %vm2128_vm0, %v2683_v35 }
  0x65   :  { %618 = vmatpush1.bf16.msra.mxu0 %v2227_v36  ;;  %1688 = vmatprep.subr.bf16.mxu1 %v2683_v35 }
  0x66   :  { %619 = vmatprep.subr.bf16.mxu0 %v2231_v38 }
  0x68   :  { %325 = vmatmul.mubr.bf16.gmra.mrb[8].mxu0 %v1897_v37  ;;  %1689 = vmatpush3.bf16.msra.mxu1 %v2255_v46 }
  0x69   :  { %620 = vmatpush1.bf16.msra.mxu0 %v2238_v40  ;;  %334 = vmatprep.mubr.bf16.mxu0 %v2681_v0 }
  0x6a   :  { %621 = vmatprep.subr.bf16.mxu0 %v2241_v41  ;;  %1690 = vmatprep.subr.bf16.mxu1 %v2683_v35 }
  0x6c   :  { %1691 = vmatpush3.bf16.msra.mxu1 %v2267_v49 }
  0x6d   :  { %622 = vmatpush1.bf16.msra.mxu0 %v2248_v44  ;;  %1692 = vmatprep.subr.bf16.mxu1 %v2683_v35 }
  0x6e   :  { %623 = vmatprep.subr.bf16.mxu0 %v2252_v45 }
  0x70   :  { %335 = vmatmul.mubr.bf16.gmra.mrb[12].mxu0 %v1906_v43  ;;  %1693 = vmatpush3.bf16.msra.mxu1 %v2276_v51 }
  0x71   :  { %624 = vmatpush1.bf16.msra.mxu0 %v2261_v47  ;;  %643 = vmatprep.mubr.bf16.mxu0 %v2681_v0 }
  0x72   :  { %625 = vmatprep.subr.bf16.mxu0 %v2264_v48  ;;  %1694 = vmatprep.subr.bf16.mxu1 %v2683_v35 }
  0x74   :  { %1695 = vmatpush3.bf16.msra.mxu1 %v2282_v52 }
  0x75   :  { %626 = vmatpush1.bf16.msra.mxu0 %v2271_v50  ;;  %1696 = vmatprep.subr.bf16.mxu1 %v2683_v35 }
  0x76   :  { %720 = vmatprep.subr.bf16.mxu0 %v2203_v24 }
  0x78   :  { %644 = vmatmul.mubr.bf16.vlgmr.msra.gmra.mrb[16].mxu0 %v2681_v0  ;;  %1697 = vmatpush3.bf16.msra.mxu1 %v2290_v53 }
  0x79   :  { %721 = vmatpush1.bf16.msra.mxu0 %v2205_v26  ;;  %752 = vmatprep.mubr.bf16.mxu0 %v2681_v0 }
  0x7a   :  { %722 = vmatprep.subr.bf16.mxu0 %v2208_v27  ;;  %1702 = vmatprep.subr.bf16.mxu1 %v2683_v35 }
  0x7b   :  { %1699 = vmatmul.mubr.bf16.vlgmr.msra.gmra.mrb[8].mxu1 %v2681_v0 }
  0x7c   :  { %1703 = vmatpush3.bf16.msra.mxu1 %v2223_v34  ;;  %1718 = vmatprep.mubr.msk.bf16.mxu1 %vm2128_vm0, %v2683_v35 }
  0x7d   :  { %723 = vmatpush1.bf16.msra.mxu0 %v2211_v29  ;;  %1704 = vmatprep.subr.bf16.mxu1 %v2683_v35 }
  0x7e   :  { %724 = vmatprep.subr.bf16.mxu0 %v2215_v30 }
  0x80   :  { %1705 = vmatpush3.bf16.msra.mxu1 %v2234_v39 }
  0x81   :  { %725 = vmatpush1.bf16.msra.mxu0 %v2218_v32  ;;  %1706 = vmatprep.subr.bf16.mxu1 %v2683_v35 }
  0x82   :  { %726 = vmatprep.subr.bf16.mxu0 %v2221_v33 }
  0x84   :  { %1707 = vmatpush3.bf16.msra.mxu1 %v2244_v42 }
  0x85   :  { %727 = vmatpush1.bf16.msra.mxu0 %v2227_v36  ;;  %1708 = vmatprep.subr.bf16.mxu1 %v2683_v35 }
  0x86   :  { %728 = vmatprep.subr.bf16.mxu0 %v2231_v38 }
  0x88   :  { %1709 = vmatpush3.bf16.msra.mxu1 %v2255_v46 }
  0x89   :  { %729 = vmatpush1.bf16.msra.mxu0 %v2238_v40  ;;  %1710 = vmatprep.subr.bf16.mxu1 %v2683_v35 }
  0x8a   :  { %730 = vmatprep.subr.bf16.mxu0 %v2241_v41 }
  0x8c   :  { %1711 = vmatpush3.bf16.msra.mxu1 %v2267_v49 }
  0x8d   :  { %731 = vmatpush1.bf16.msra.mxu0 %v2248_v44  ;;  %1712 = vmatprep.subr.bf16.mxu1 %v2683_v35 }
  0x8e   :  { %732 = vmatprep.subr.bf16.mxu0 %v2252_v45 }
  0x90   :  { %1713 = vmatpush3.bf16.msra.mxu1 %v2276_v51 }
  0x91   :  { %733 = vmatpush1.bf16.msra.mxu0 %v2261_v47  ;;  %1714 = vmatprep.subr.bf16.mxu1 %v2683_v35 }
  0x92   :  { %734 = vmatprep.subr.bf16.mxu0 %v2264_v48 }
  0x94   :  { %1715 = vmatpush3.bf16.msra.mxu1 %v2282_v52 }
  0x95   :  { %735 = vmatpush1.bf16.msra.mxu0 %v2271_v50  ;;  %1716 = vmatprep.subr.bf16.mxu1 %v2683_v35 }
  0x96   :  { %829 = vmatprep.subr.bf16.mxu0 %v2203_v24 }
  0x98   :  { %1717 = vmatpush3.bf16.msra.mxu1 %v2290_v53 }
  0x99   :  { %1722 = vmatprep.subr.bf16.mxu1 %v2683_v35 }
 0x12b   :  { %v306_v59 = vpop.f32.mrb[0].mxu0 }
 0x12c   :  { %v308_v61 = vpop.f32.mrb[1].mxu0 }
 0x12d   :  { %v310_v63 = vpop.f32.mrb[2].mxu0  ;;  %v309_v3 = vadd.f32 %v308_v61, %v112_v62 }
 0x12e   :  { %v2335_v1 = vadd.f32 %v310_v63, %v108_v60  ;;  %v312_v2 = vpop.f32.mrb[3].mxu0  ;;  %v1676_v11 = vpop.f32.mrb[0].mxu1 }
 0x12f   :  { %v2338_v4 = vadd.f32 %v312_v2, %v112_v62  ;;  %v2351_v14 = vadd.f32 %v1676_v11, %v2342_v5  ;;  %v379_v15 = vpop.f32.mrb[1].mxu1 }
 0x130   :  { %v1677_v17 = vpop.f32.mrb[2].mxu1 }
 0x131   :  { %v2356_v18 = vadd.f32 %v1677_v17, %v2342_v5  ;;  %v382_v19 = vpop.f32.mrb[3].mxu1 }
 0x132   :  { %v2359_v20 = vadd.f32 %v382_v19, %v2342_v5 }
 0x133   :  { %v316_v6 = vpop.f32.mrb[4].mxu0 }
 0x134   :  { %v2344_v7 = vadd.f32 %v316_v6, %v108_v60  ;;  %v318_v8 = vpop.f32.mrb[5].mxu0 }
 0x135   :  { %v2346_v9 = vadd.f32 %v318_v8, %v112_v62  ;;  %v320_v10 = vpop.f32.mrb[6].mxu0 }
 0x136   :  { %v2348_v12 = vadd.f32 %v320_v10, %v108_v60  ;;  %v322_v13 = vpop.f32.mrb[7].mxu0  ;;  %v1680_v31 = vpop.f32.mrb[4].mxu1 }
 0x137   :  { %v2353_v16 = vadd.f32 %v322_v13, %v112_v62  ;;  %v2368_v54 = vadd.f32 %v1680_v31, %v2342_v5  ;;  %v395_v57 = vpop.f32.mrb[5].mxu1 }
 0x138   :  { %v2373_v2 = vadd.f32 %v395_v57, %v2342_v5  ;;  %v1681_v6 = vpop.f32.mrb[6].mxu1 }
 0x139   :  { %2686 = vst [vmem:[#allocation13_spill] sm:$0xff] %v2368_v54  ;;  %v2376_v8 = vadd.f32 %v1681_v6, %v2342_v5  ;;  %v398_v10 = vpop.f32.mrb[7].mxu1 }
 0x13a   :  { %v2379_v11 = vadd.f32 %v398_v10, %v2342_v5 }
 0x13b   :  { %v326_v21 = vpop.f32.mrb[8].mxu0  ;;  %2688 = vst [vmem:[#allocation15_spill] sm:$0xff] %v2376_v8 }
 0x13c   :  { %v2361_v22 = vadd.f32 %v326_v21, %v108_v60  ;;  %v328_v23 = vpop.f32.mrb[9].mxu0  ;;  %2689 = vst [vmem:[#allocation16_spill] sm:$0xff] %v2379_v11 }
 0x13d   :  { %v2363_v25 = vadd.f32 %v328_v23, %v112_v62  ;;  %v330_v28 = vpop.f32.mrb[10].mxu0 }
 0x13e   :  { %v2365_v37 = vadd.f32 %v330_v28, %v108_v60  ;;  %v332_v43 = vpop.f32.mrb[11].mxu0  ;;  %v466_v28 = vld [vmem:[%s2679_s4] sm:$0x7]  ;;  %s2129_s4 = smov [#allocation9]  }
 0x13f   :  { %v2370_v63 = vadd.f32 %v332_v43, %v112_v62  ;;  %v2392_v6 = vrot.slane %v466_v28, %v107_v56  ;;  %v2394_v10 = vrot.slane %v466_v28, %v111_v58  ;;  %s1489_s8 = sshll.u32 %s2129_s4, 4  ;;  %s1490_s8 = int_to_ptr.vmem [resolvable:$true] %s1489_s8 }
 0x140   :  { %s2091_s9 = scalar_lea.vmem %s1490_s8, 128  ;;  %p2096_p11 = scmp.lt.s32.totalorder %s1490_s8, %s1490_s8 }
 0x141   :  { %2687 = vst [vmem:[#allocation14_spill] sm:$0xff] %v2370_v63  ;;  %p2092_p10 = scmp.ne.s32.totalorder %s1490_s8, %s2091_s9  ;;  %p2097_p12 = scmp.lt.s32.totalorder %s2091_s9, %s2091_s9 }
 0x143   :  { %v336_v13 = vpop.f32.mrb[12].mxu0  ;;  %p2098_p13 = por %p2097_p12, %p2096_p11 }
 0x144   :  { %v2381_v17 = vadd.f32 %v336_v13, %v108_v60  ;;  %v338_v19 = vpop.f32.mrb[13].mxu0  ;;  %v307_v13 = vadd.f32 %v306_v59, %v108_v60 }
 0x145   :  { %v2383_v21 = vadd.f32 %v338_v19, %v112_v62  ;;  %v340_v23 = vpop.f32.mrb[14].mxu0  ;;  %p2099_p0 = pnand %p2098_p13, %p2092_p10 }
 0x146   :  { %2690 = vst [vmem:[#allocation17_spill] sm:$0xff] %v2381_v17  ;;  %v2388_v31 = vadd.f32 %v340_v23, %v108_v60  ;;  %v342_v43 = vpop.f32.mrb[15].mxu0 }
 0x147   :  { %2691 = vst [vmem:[#allocation18_spill] sm:$0xff] %v2383_v21  ;;  %v2390_v57 = vadd.f32 %v342_v43, %v112_v62 }
 0x148   :  { %2692 = vst [vmem:[#allocation19_spill] sm:$0xff] %v2388_v31 }
 0x149   :  { %2693 = vst [vmem:[#allocation20_spill] sm:$0xff] %v2390_v57 }
 0x14b   :  { %v645_v0 = vpop.f32.mrb[16].mxu0 }
 0x14c   :  { %v646_v35 = vadd.f32 %v645_v0, %v2392_v6  ;;  %v647_v19 = vpop.f32.mrb[17].mxu0  ;;  %v2694_v0 = vsub.s32 2, %v2328_v55 }
 0x14d   :  { %v648_v8 = vadd.f32 %v647_v19, %v2394_v10  ;;  %v649_v54 = vpop.f32.mrb[18].mxu0 }
 0x14e   :  { %v698_v21 = vadd.f32 %v646_v35, %v307_v13  ;;  %v650_v17 = vpop.f32.mrb[19].mxu0  ;;  %v686_v57 = vpop.f32.mrb[8].mxu1  ;;  %v2400_v60 = vrot.slane %v466_v28, %v2694_v0  ;;  %v380_v54 = vadd.f32 %v379_v15, %v2342_v5  ;;  %v2695_v5 = vmov 0.0  }
 0x14f   :  { %v705_v23 = vadd.f32 %v648_v8, %v309_v3  ;;  %v1700_v56 = vpop.f32.mrb[9].mxu1  ;;  %v2696_v15 = vmov 0  }
 0x150   :  { %v1558_v31 = vmul.f32 -1.442695, %v698_v21  ;;  %v689_v11 = vpop.f32.mrb[10].mxu1  ;;  %v687_v35 = vadd.f32 %v686_v57, %v2400_v60 }
 0x151   :  { %v1559_v43 = vmul.f32 -1.442695, %v705_v23  ;;  %v1701_v58 = vpop.f32.mrb[11].mxu1 }
 0x152   :  { %1921 = vpow2.f32 %v1558_v31 }
 0x153   :  { %1923 = vpow2.f32 %v1559_v43 }
 0x15c   :  { %v1922_v63 = vpop.eup %1921 }
 0x15d   :  { %v702_v59 = vadd.f32 1.0, %v1922_v63  ;;  %v1924_v61 = vpop.eup %1923 }
 0x15e   :  { %v709_v62 = vadd.f32 1.0, %v1924_v61 }
 0x15f   :  { %1925 = vrcp.f32 %v702_v59 }
 0x160   :  { %1927 = vrcp.f32 %v709_v62 }
 0x169   :  { %v1926_v3 = vpop.eup %1925 }
 0x16a   :  { %v712_v8 = vmul.f32 %v1926_v3, %v687_v35  ;;  %v1928_v11 = vpop.eup %1927 }
 0x16b   :  { %v715_v21 = vsub.f32 1.0, %v1928_v11  ;;  %v717_v13 = vmul.f32 0.0, %v1928_v11 }
 0x16c   :  { %v713_v17 = vadd.f32 %v712_v8, %v380_v54 }
 0x16e   :  { %1929 = vtanh.f32 %v713_v17 }
 0x178   :  { %v1930_v31 = vpop.eup %1929 }
 0x179   :  { %v716_v63 = vmul.f32 %v1930_v31, %v715_v21 }
 0x17b   :  { %v2404_v19 = vadd.f32 %v717_v13, %v716_v63 }
 0x17d   :  { %v719_v55 = vpack.c.bf16 %v2404_v19, %v2404_v19 }
 0x17f   :  { %753 = vmatmul.mubr.bf16.vlgmr.msra.gmra.mrb[20].mxu0 %v719_v55  ;;  %1719 = vmatmul.mubr.bf16.vlgmr.msra.gmra.mrb[12].mxu1 %v719_v55 }
 0x180   :  { %830 = vmatpush1.bf16.msra.mxu0 %v2205_v26  ;;  %1723 = vmatpush3.bf16.msra.mxu1 %v2223_v34 }
 0x181   :  { %831 = vmatprep.subr.bf16.mxu0 %v2208_v27  ;;  %1724 = vmatprep.subr.bf16.mxu1 %v2695_v5 }
 0x182   :  { %861 = vmatprep.mubr.bf16.mxu0 %v2696_v15  ;;  %1738 = vmatprep.mubr.msk.bf16.mxu1 %vm2128_vm0, %v2695_v5 }
 0x184   :  { %832 = vmatpush1.bf16.msra.mxu0 %v2211_v29  ;;  %1725 = vmatpush3.bf16.msra.mxu1 %v2234_v39 }
 0x185   :  { %833 = vmatprep.subr.bf16.mxu0 %v2215_v30  ;;  %1726 = vmatprep.subr.bf16.mxu1 %v2695_v5 }
 0x188   :  { %834 = vmatpush1.bf16.msra.mxu0 %v2218_v32  ;;  %1727 = vmatpush3.bf16.msra.mxu1 %v2244_v42 }
 0x189   :  { %835 = vmatprep.subr.bf16.mxu0 %v2221_v33  ;;  %1728 = vmatprep.subr.bf16.mxu1 %v2695_v5 }
 0x18c   :  { %836 = vmatpush1.bf16.msra.mxu0 %v2227_v36  ;;  %1729 = vmatpush3.bf16.msra.mxu1 %v2255_v46 }
 0x18d   :  { %837 = vmatprep.subr.bf16.mxu0 %v2231_v38  ;;  %1730 = vmatprep.subr.bf16.mxu1 %v2695_v5 }
 0x190   :  { %838 = vmatpush1.bf16.msra.mxu0 %v2238_v40  ;;  %1731 = vmatpush3.bf16.msra.mxu1 %v2267_v49 }
 0x191   :  { %839 = vmatprep.subr.bf16.mxu0 %v2241_v41  ;;  %1732 = vmatprep.subr.bf16.mxu1 %v2695_v5 }
 0x194   :  { %840 = vmatpush1.bf16.msra.mxu0 %v2248_v44  ;;  %1733 = vmatpush3.bf16.msra.mxu1 %v2276_v51 }
 0x195   :  { %841 = vmatprep.subr.bf16.mxu0 %v2252_v45  ;;  %1734 = vmatprep.subr.bf16.mxu1 %v2695_v5 }
 0x198   :  { %842 = vmatpush1.bf16.msra.mxu0 %v2261_v47  ;;  %1735 = vmatpush3.bf16.msra.mxu1 %v2282_v52 }
 0x199   :  { %843 = vmatprep.subr.bf16.mxu0 %v2264_v48  ;;  %1736 = vmatprep.subr.bf16.mxu1 %v2695_v5 }
 0x19c   :  { %844 = vmatpush1.bf16.msra.mxu0 %v2271_v50  ;;  %1737 = vmatpush3.bf16.msra.mxu1 %v2290_v53 }
 0x19d   :  { %938 = vmatprep.subr.bf16.mxu0 %v2203_v24  ;;  %1742 = vmatprep.subr.bf16.mxu1 %v2695_v5 }
 0x252   :  { %v754_v28 = vpop.f32.mrb[20].mxu0  ;;  %v795_v57 = vpop.f32.mrb[12].mxu1 }
 0x253   :  { %v755_v23 = vadd.f32 %v754_v28, %v2392_v6  ;;  %v756_v43 = vpop.f32.mrb[21].mxu0  ;;  %v1720_v56 = vpop.f32.mrb[13].mxu1  ;;  %v796_v63 = vadd.f32 %v795_v57, %v2400_v60 }
 0x254   :  { %v757_v58 = vadd.f32 %v756_v43, %v2394_v10  ;;  %v758_v59 = vpop.f32.mrb[22].mxu0  ;;  %v798_v0 = vpop.f32.mrb[14].mxu1 }
 0x255   :  { %v807_v61 = vadd.f32 %v755_v23, %v2335_v1  ;;  %v759_v62 = vpop.f32.mrb[23].mxu0  ;;  %v1721_v35 = vpop.f32.mrb[15].mxu1 }
 0x256   :  { %v814_v3 = vadd.f32 %v757_v58, %v2338_v4 }
 0x257   :  { %v1560_v54 = vmul.f32 -1.442695, %v807_v61 }
 0x258   :  { %v1561_v8 = vmul.f32 -1.442695, %v814_v3 }
 0x259   :  { %1931 = vpow2.f32 %v1560_v54 }
 0x25a   :  { %1933 = vpow2.f32 %v1561_v8 }
 0x263   :  { %v1932_v17 = vpop.eup %1931 }
 0x264   :  { %v811_v11 = vadd.f32 1.0, %v1932_v17  ;;  %v1934_v21 = vpop.eup %1933 }
 0x265   :  { %v818_v31 = vadd.f32 1.0, %v1934_v21 }
 0x266   :  { %1935 = vrcp.f32 %v811_v11 }
 0x267   :  { %1937 = vrcp.f32 %v818_v31 }
 0x270   :  { %v1936_v13 = vpop.eup %1935 }
 0x271   :  { %v821_v55 = vmul.f32 %v1936_v13, %v796_v63  ;;  %v1938_v28 = vpop.eup %1937 }
 0x272   :  { %v824_v23 = vsub.f32 1.0, %v1938_v28  ;;  %v826_v56 = vmul.f32 %v1938_v28, %v2404_v19 }
 0x273   :  { %v822_v1 = vadd.f32 %v821_v55, %v2359_v20 }
 0x275   :  { %1939 = vtanh.f32 %v822_v1 }
 0x27f   :  { %v1940_v4 = vpop.eup %1939 }
 0x280   :  { %v825_v43 = vmul.f32 %v1940_v4, %v824_v23 }
 0x282   :  { %v2450_v58 = vadd.f32 %v826_v56, %v825_v43 }
 0x284   :  { %v828_v59 = vpack.c.bf16 %v2450_v58, %v2450_v58 }
 0x286   :  { %862 = vmatmul.mubr.bf16.vlgmr.msra.gmra.mrb[24].mxu0 %v828_v59  ;;  %1739 = vmatmul.mubr.bf16.vlgmr.msra.gmra.mrb[16].mxu1 %v828_v59 }
 0x287   :  { %939 = vmatpush1.bf16.msra.mxu0 %v2205_v26  ;;  %1743 = vmatpush3.bf16.msra.mxu1 %v2223_v34 }
 0x288   :  { %940 = vmatprep.subr.bf16.mxu0 %v2208_v27  ;;  %1744 = vmatprep.subr.bf16.mxu1 %v2695_v5 }
 0x289   :  { %970 = vmatprep.mubr.bf16.mxu0 %v2696_v15  ;;  %1758 = vmatprep.mubr.msk.bf16.mxu1 %vm2128_vm0, %v2695_v5 }
 0x28b   :  { %941 = vmatpush1.bf16.msra.mxu0 %v2211_v29  ;;  %1745 = vmatpush3.bf16.msra.mxu1 %v2234_v39 }
 0x28c   :  { %942 = vmatprep.subr.bf16.mxu0 %v2215_v30  ;;  %1746 = vmatprep.subr.bf16.mxu1 %v2695_v5 }
 0x28f   :  { %943 = vmatpush1.bf16.msra.mxu0 %v2218_v32  ;;  %1747 = vmatpush3.bf16.msra.mxu1 %v2244_v42 }
 0x290   :  { %944 = vmatprep.subr.bf16.mxu0 %v2221_v33  ;;  %1748 = vmatprep.subr.bf16.mxu1 %v2695_v5 }
 0x293   :  { %945 = vmatpush1.bf16.msra.mxu0 %v2227_v36  ;;  %1749 = vmatpush3.bf16.msra.mxu1 %v2255_v46 }
 0x294   :  { %946 = vmatprep.subr.bf16.mxu0 %v2231_v38  ;;  %1750 = vmatprep.subr.bf16.mxu1 %v2695_v5 }
 0x297   :  { %947 = vmatpush1.bf16.msra.mxu0 %v2238_v40  ;;  %1751 = vmatpush3.bf16.msra.mxu1 %v2267_v49 }
 0x298   :  { %948 = vmatprep.subr.bf16.mxu0 %v2241_v41  ;;  %1752 = vmatprep.subr.bf16.mxu1 %v2695_v5 }
 0x29b   :  { %949 = vmatpush1.bf16.msra.mxu0 %v2248_v44  ;;  %1753 = vmatpush3.bf16.msra.mxu1 %v2276_v51 }
 0x29c   :  { %950 = vmatprep.subr.bf16.mxu0 %v2252_v45  ;;  %1754 = vmatprep.subr.bf16.mxu1 %v2695_v5 }
 0x29f   :  { %951 = vmatpush1.bf16.msra.mxu0 %v2261_v47  ;;  %1755 = vmatpush3.bf16.msra.mxu1 %v2282_v52 }
 0x2a0   :  { %952 = vmatprep.subr.bf16.mxu0 %v2264_v48  ;;  %1756 = vmatprep.subr.bf16.mxu1 %v2695_v5 }
 0x2a3   :  { %953 = vmatpush1.bf16.msra.mxu0 %v2271_v50  ;;  %1757 = vmatpush3.bf16.msra.mxu1 %v2290_v53 }
 0x2a4   :  { %1047 = vmatprep.subr.bf16.mxu0 %v2203_v24  ;;  %1762 = vmatprep.subr.bf16.mxu1 %v2695_v5 }
 0x359   :  { %v863_v20 = vpop.f32.mrb[24].mxu0  ;;  %v904_v19 = vpop.f32.mrb[16].mxu1 }
 0x35a   :  { %v864_v57 = vadd.f32 %v863_v20, %v2392_v6  ;;  %v865_v0 = vpop.f32.mrb[25].mxu0  ;;  %v1740_v61 = vpop.f32.mrb[17].mxu1  ;;  %v905_v28 = vadd.f32 %v904_v19, %v2400_v60 }
 0x35b   :  { %v866_v62 = vadd.f32 %v865_v0, %v2394_v10  ;;  %v867_v35 = vpop.f32.mrb[26].mxu0  ;;  %v907_v3 = vpop.f32.mrb[18].mxu1 }
 0x35c   :  { %v916_v54 = vadd.f32 %v864_v57, %v2344_v7  ;;  %v868_v8 = vpop.f32.mrb[27].mxu0  ;;  %v1741_v17 = vpop.f32.mrb[19].mxu1 }
 0x35d   :  { %v923_v11 = vadd.f32 %v866_v62, %v2346_v9 }
 0x35e   :  { %v1562_v21 = vmul.f32 -1.442695, %v916_v54 }
 0x35f   :  { %v1563_v31 = vmul.f32 -1.442695, %v923_v11 }
 0x360   :  { %1941 = vpow2.f32 %v1562_v21 }
 0x361   :  { %1943 = vpow2.f32 %v1563_v31 }
 0x36a   :  { %v1942_v63 = vpop.eup %1941 }
 0x36b   :  { %v920_v13 = vadd.f32 1.0, %v1942_v63  ;;  %v1944_v55 = vpop.eup %1943 }
 0x36c   :  { %v927_v1 = vadd.f32 1.0, %v1944_v55 }
 0x36d   :  { %1945 = vrcp.f32 %v920_v13 }
 0x36e   :  { %1947 = vrcp.f32 %v927_v1 }
 0x377   :  { %v1946_v23 = vpop.eup %1945 }
 0x378   :  { %v930_v4 = vmul.f32 %v1946_v23, %v905_v28  ;;  %v1948_v43 = vpop.eup %1947 }
 0x379   :  { %v933_v56 = vsub.f32 1.0, %v1948_v43  ;;  %v935_v20 = vmul.f32 %v1948_v43, %v2450_v58 }
 0x37a   :  { %v931_v7 = vadd.f32 %v930_v4, %v2351_v14 }
 0x37c   :  { %1949 = vtanh.f32 %v931_v7 }
 0x386   :  { %v1950_v9 = vpop.eup %1949 }
 0x387   :  { %v934_v59 = vmul.f32 %v1950_v9, %v933_v56 }
 0x389   :  { %v2496_v57 = vadd.f32 %v935_v20, %v934_v59 }
 0x38b   :  { %v937_v0 = vpack.c.bf16 %v2496_v57, %v2496_v57 }
 0x38d   :  { %971 = vmatmul.mubr.bf16.vlgmr.msra.gmra.mrb[28].mxu0 %v937_v0  ;;  %1759 = vmatmul.mubr.bf16.vlgmr.msra.gmra.mrb[20].mxu1 %v937_v0 }
 0x38e   :  { %1048 = vmatpush1.bf16.msra.mxu0 %v2205_v26  ;;  %1763 = vmatpush3.bf16.msra.mxu1 %v2223_v34 }
 0x38f   :  { %1049 = vmatprep.subr.bf16.mxu0 %v2208_v27  ;;  %1764 = vmatprep.subr.bf16.mxu1 %v2695_v5 }
 0x390   :  { %1079 = vmatprep.mubr.bf16.mxu0 %v2696_v15  ;;  %1778 = vmatprep.mubr.msk.bf16.mxu1 %vm2128_vm0, %v2695_v5 }
 0x392   :  { %1050 = vmatpush1.bf16.msra.mxu0 %v2211_v29  ;;  %1765 = vmatpush3.bf16.msra.mxu1 %v2234_v39 }
 0x393   :  { %1051 = vmatprep.subr.bf16.mxu0 %v2215_v30  ;;  %1766 = vmatprep.subr.bf16.mxu1 %v2695_v5 }
 0x396   :  { %1052 = vmatpush1.bf16.msra.mxu0 %v2218_v32  ;;  %1767 = vmatpush3.bf16.msra.mxu1 %v2244_v42 }
 0x397   :  { %1053 = vmatprep.subr.bf16.mxu0 %v2221_v33  ;;  %1768 = vmatprep.subr.bf16.mxu1 %v2695_v5 }
 0x39a   :  { %1054 = vmatpush1.bf16.msra.mxu0 %v2227_v36  ;;  %1769 = vmatpush3.bf16.msra.mxu1 %v2255_v46 }
 0x39b   :  { %1055 = vmatprep.subr.bf16.mxu0 %v2231_v38  ;;  %1770 = vmatprep.subr.bf16.mxu1 %v2695_v5 }
 0x39e   :  { %1056 = vmatpush1.bf16.msra.mxu0 %v2238_v40  ;;  %1771 = vmatpush3.bf16.msra.mxu1 %v2267_v49 }
 0x39f   :  { %1057 = vmatprep.subr.bf16.mxu0 %v2241_v41  ;;  %1772 = vmatprep.subr.bf16.mxu1 %v2695_v5 }
 0x3a2   :  { %1058 = vmatpush1.bf16.msra.mxu0 %v2248_v44  ;;  %1773 = vmatpush3.bf16.msra.mxu1 %v2276_v51 }
 0x3a3   :  { %1059 = vmatprep.subr.bf16.mxu0 %v2252_v45  ;;  %1774 = vmatprep.subr.bf16.mxu1 %v2695_v5 }
 0x3a6   :  { %1060 = vmatpush1.bf16.msra.mxu0 %v2261_v47  ;;  %1775 = vmatpush3.bf16.msra.mxu1 %v2282_v52 }
 0x3a7   :  { %1061 = vmatprep.subr.bf16.mxu0 %v2264_v48  ;;  %1776 = vmatprep.subr.bf16.mxu1 %v2695_v5 }
 0x3aa   :  { %1062 = vmatpush1.bf16.msra.mxu0 %v2271_v50  ;;  %1777 = vmatpush3.bf16.msra.mxu1 %v2290_v53 }
 0x3ab   :  { %1156 = vmatprep.subr.bf16.mxu0 %v2203_v24  ;;  %1782 = vmatprep.subr.bf16.mxu1 %v2695_v5 }
 0x460   :  { %v972_v14 = vpop.f32.mrb[28].mxu0  ;;  %v1013_v58 = vpop.f32.mrb[20].mxu1 }
 0x461   :  { %v973_v19 = vadd.f32 %v972_v14, %v2392_v6  ;;  %v974_v61 = vpop.f32.mrb[29].mxu0  ;;  %v1760_v62 = vpop.f32.mrb[21].mxu1  ;;  %v1014_v23 = vadd.f32 %v1013_v58, %v2400_v60 }
 0x462   :  { %v975_v35 = vadd.f32 %v974_v61, %v2394_v10  ;;  %v976_v3 = vpop.f32.mrb[30].mxu0  ;;  %v1016_v54 = vpop.f32.mrb[22].mxu1 }
 0x463   :  { %v1025_v8 = vadd.f32 %v973_v19, %v2348_v12  ;;  %v977_v17 = vpop.f32.mrb[31].mxu0  ;;  %v1761_v11 = vpop.f32.mrb[23].mxu1 }
 0x464   :  { %v1032_v21 = vadd.f32 %v975_v35, %v2353_v16 }
 0x465   :  { %v1564_v31 = vmul.f32 -1.442695, %v1025_v8 }
 0x466   :  { %v1565_v63 = vmul.f32 -1.442695, %v1032_v21 }
 0x467   :  { %1951 = vpow2.f32 %v1564_v31 }
 0x468   :  { %1953 = vpow2.f32 %v1565_v63 }
 0x471   :  { %v1952_v13 = vpop.eup %1951 }
 0x472   :  { %v1029_v55 = vadd.f32 1.0, %v1952_v13  ;;  %v1954_v1 = vpop.eup %1953 }
 0x473   :  { %v1036_v28 = vadd.f32 1.0, %v1954_v1 }
 0x474   :  { %1955 = vrcp.f32 %v1029_v55 }
 0x475   :  { %1957 = vrcp.f32 %v1036_v28 }
 0x47e   :  { %v1956_v4 = vpop.eup %1955 }
 0x47f   :  { %v1039_v7 = vmul.f32 %v1956_v4, %v1014_v23  ;;  %v1958_v43 = vpop.eup %1957 }
 0x480   :  { %v1042_v56 = vsub.f32 1.0, %v1958_v43  ;;  %v1044_v59 = vmul.f32 %v1958_v43, %v2496_v57 }
 0x481   :  { %v1040_v12 = vadd.f32 %v1039_v7, %v2356_v18 }
 0x483   :  { %1959 = vtanh.f32 %v1040_v12 }
 0x48d   :  { %v1960_v16 = vpop.eup %1959 }
 0x48e   :  { %v1043_v9 = vmul.f32 %v1960_v16, %v1042_v56  ;;  %v2592_v56 = vld [vmem:[#allocation8] ss:$12 sps:$4 sm:$0xff]  }
 0x48f   :  { %v2698_v16 = vld [vmem:[#allocation16_spill] sm:$0xff] }
 0x490   :  { %v2542_v20 = vadd.f32 %v1044_v59, %v1043_v9 }
 0x492   :  { %v1046_v0 = vpack.c.bf16 %v2542_v20, %v2542_v20 }
 0x494   :  { %1080 = vmatmul.mubr.bf16.vlgmr.msra.gmra.mrb[32].mxu0 %v1046_v0  ;;  %1779 = vmatmul.mubr.bf16.vlgmr.msra.gmra.mrb[24].mxu1 %v1046_v0 }
 0x495   :  { %1157 = vmatpush1.bf16.msra.mxu0 %v2205_v26  ;;  %1783 = vmatpush3.bf16.msra.mxu1 %v2223_v34 }
 0x496   :  { %1158 = vmatprep.subr.bf16.mxu0 %v2208_v27  ;;  %1784 = vmatprep.subr.bf16.mxu1 %v2695_v5 }
 0x497   :  { %1188 = vmatprep.mubr.bf16.mxu0 %v2696_v15  ;;  %1798 = vmatprep.mubr.msk.bf16.mxu1 %vm2128_vm0, %v2695_v5 }
 0x499   :  { %1159 = vmatpush1.bf16.msra.mxu0 %v2211_v29  ;;  %1785 = vmatpush3.bf16.msra.mxu1 %v2234_v39 }
 0x49a   :  { %1160 = vmatprep.subr.bf16.mxu0 %v2215_v30  ;;  %1786 = vmatprep.subr.bf16.mxu1 %v2695_v5 }
 0x49d   :  { %1161 = vmatpush1.bf16.msra.mxu0 %v2218_v32  ;;  %1787 = vmatpush3.bf16.msra.mxu1 %v2244_v42 }
 0x49e   :  { %1162 = vmatprep.subr.bf16.mxu0 %v2221_v33  ;;  %1788 = vmatprep.subr.bf16.mxu1 %v2695_v5 }
 0x4a1   :  { %1163 = vmatpush1.bf16.msra.mxu0 %v2227_v36  ;;  %1789 = vmatpush3.bf16.msra.mxu1 %v2255_v46 }
 0x4a2   :  { %1164 = vmatprep.subr.bf16.mxu0 %v2231_v38  ;;  %1790 = vmatprep.subr.bf16.mxu1 %v2695_v5 }
 0x4a5   :  { %1165 = vmatpush1.bf16.msra.mxu0 %v2238_v40  ;;  %1791 = vmatpush3.bf16.msra.mxu1 %v2267_v49 }
 0x4a6   :  { %1166 = vmatprep.subr.bf16.mxu0 %v2241_v41  ;;  %1792 = vmatprep.subr.bf16.mxu1 %v2695_v5 }
 0x4a9   :  { %1167 = vmatpush1.bf16.msra.mxu0 %v2248_v44  ;;  %1793 = vmatpush3.bf16.msra.mxu1 %v2276_v51 }
 0x4aa   :  { %1168 = vmatprep.subr.bf16.mxu0 %v2252_v45  ;;  %1794 = vmatprep.subr.bf16.mxu1 %v2695_v5 }
 0x4ad   :  { %1169 = vmatpush1.bf16.msra.mxu0 %v2261_v47  ;;  %1795 = vmatpush3.bf16.msra.mxu1 %v2282_v52 }
 0x4ae   :  { %1170 = vmatprep.subr.bf16.mxu0 %v2264_v48  ;;  %1796 = vmatprep.subr.bf16.mxu1 %v2695_v5 }
 0x4b1   :  { %1171 = vmatpush1.bf16.msra.mxu0 %v2271_v50  ;;  %1797 = vmatpush3.bf16.msra.mxu1 %v2290_v53 }
 0x4b2   :  { %1265 = vmatprep.subr.bf16.mxu0 %v2203_v24  ;;  %1802 = vmatprep.subr.bf16.mxu1 %v2695_v5 }
 0x567   :  { %v1081_v26 = vpop.f32.mrb[32].mxu0  ;;  %v1122_v18 = vpop.f32.mrb[24].mxu1 }
 0x568   :  { %v1082_v57 = vadd.f32 %v1081_v26, %v2392_v6  ;;  %v1083_v14 = vpop.f32.mrb[33].mxu0  ;;  %v1780_v58 = vpop.f32.mrb[25].mxu1  ;;  %v1123_v13 = vadd.f32 %v1122_v18, %v2400_v60 }
 0x569   :  { %v1084_v19 = vadd.f32 %v1083_v14, %v2394_v10  ;;  %v1085_v61 = vpop.f32.mrb[34].mxu0  ;;  %v1125_v62 = vpop.f32.mrb[26].mxu1  ;;  %v2003_v14 = vld [vmem:[#allocation8 + $0x8] ss:$12 sps:$4 sm:$0xff]  }
 0x56a   :  { %v1134_v35 = vadd.f32 %v1082_v57, %v2361_v22  ;;  %v1086_v3 = vpop.f32.mrb[35].mxu0  ;;  %v1781_v54 = vpop.f32.mrb[27].mxu1  ;;  %v2004_v58 = vld [vmem:[#allocation8 + $0x1c] ss:$12 sps:$4 sm:$0xff]   ;;  %v2006_v61 = vld [vmem:[#allocation8 + $0x20] ss:$12 sps:$4 sm:$0xff]  }
 0x56b   :  { %v1141_v8 = vadd.f32 %v1084_v19, %v2363_v25  ;;  %v2005_v19 = vld [vmem:[#allocation8 + $0x18] ss:$12 sps:$4 sm:$0xff]   ;;  %v2007_v62 = vld [vmem:[#allocation8 + $0x34] ss:$12 sps:$4 sm:$0xff]  }
 0x56c   :  { %v1566_v17 = vmul.f32 -1.442695, %v1134_v35  ;;  %v2008_v35 = vld [vmem:[#allocation8 + $0x30] ss:$12 sps:$4 sm:$0xff]   ;;  %v2009_v3 = vld [vmem:[#allocation8 + $0x38] ss:$12 sps:$4 sm:$0xff]  }
 0x56d   :  { %v1567_v24 = vmul.f32 -1.442695, %v1141_v8  ;;  %v2010_v54 = vld [vmem:[#allocation8 + $0x4c] ss:$12 sps:$4 sm:$0xff]   ;;  %v2012_v8 = vld [vmem:[#allocation8 + $0x50] ss:$12 sps:$4 sm:$0xff]  }
 0x56e   :  { %1961 = vpow2.f32 %v1566_v17  ;;  %v2013_v17 = vld [vmem:[#allocation8 + $0x64] ss:$12 sps:$4 sm:$0xff]  }
 0x56f   :  { %1963 = vpow2.f32 %v1567_v24  ;;  %v2014_v24 = vld [vmem:[#allocation8 + $0x60] ss:$12 sps:$4 sm:$0xff]  }
 0x578   :  { %v1962_v11 = vpop.eup %1961 }
 0x579   :  { %v1138_v21 = vadd.f32 1.0, %v1962_v11  ;;  %v1964_v31 = vpop.eup %1963  ;;  %v2015_v11 = vld [vmem:[#allocation8 + $0x68] ss:$12 sps:$4 sm:$0xff]  }
 0x57a   :  { %v1145_v63 = vadd.f32 1.0, %v1964_v31  ;;  %v2017_v31 = vld [vmem:[#allocation8 + $0x78] ss:$12 sps:$4 sm:$0xff]  }
 0x57b   :  { %1965 = vrcp.f32 %v1138_v21  ;;  %v2016_v21 = vld [vmem:[#allocation8 + $0x7c] ss:$12 sps:$4 sm:$0xff]  }
 0x57c   :  { %1967 = vrcp.f32 %v1145_v63  ;;  %v2018_v63 = vld [vmem:[#allocation8 + $0x80] ss:$12 sps:$4 sm:$0xff]  }
 0x585   :  { %v1966_v55 = vpop.eup %1965 }
 0x586   :  { %v1148_v1 = vmul.f32 %v1966_v55, %v1123_v13  ;;  %v1968_v28 = vpop.eup %1967  ;;  %v2019_v13 = vld [vmem:[#allocation8 + $0x94] ss:$12 sps:$4 sm:$0xff]   ;;  %v2020_v55 = vld [vmem:[#allocation8 + $0x90] ss:$12 sps:$4 sm:$0xff]  }
 0x587   :  { %v1151_v23 = vsub.f32 1.0, %v1968_v28  ;;  %v1153_v7 = vmul.f32 %v1968_v28, %v2542_v20  ;;  %v2023_v28 = vld [vmem:[#allocation8 + $0xa8] ss:$12 sps:$4 sm:$0xff]  }
 0x588   :  { %v1149_v22 = vadd.f32 %v1148_v1, %v2373_v2  ;;  %v2021_v1 = vld [vmem:[#allocation8 + $0x98] ss:$12 sps:$4 sm:$0xff]  }
 0x58a   :  { %1969 = vtanh.f32 %v1149_v22  ;;  %v2022_v22 = vld [vmem:[#allocation8 + $0xac] ss:$12 sps:$4 sm:$0xff]  }
 0x594   :  { %v1970_v25 = vpop.eup %1969 }
 0x595   :  { %v1152_v4 = vmul.f32 %v1970_v25, %v1151_v23  ;;  %v2024_v23 = vld [vmem:[#allocation8 + $0xb0] ss:$12 sps:$4 sm:$0xff]  }
 0x597   :  { %v2588_v12 = vadd.f32 %v1153_v7, %v1152_v4 }
 0x599   :  { %v1155_v43 = vpack.c.bf16 %v2588_v12, %v2588_v12 }
 0x59b   :  { %1189 = vmatmul.mubr.bf16.vlgmr.msra.gmra.mrb[36].mxu0 %v1155_v43  ;;  %1799 = vmatmul.mubr.bf16.vlgmr.msra.gmra.mrb[28].mxu1 %v1155_v43 }
 0x59c   :  { %1266 = vmatpush1.bf16.msra.mxu0 %v2592_v56  ;;  %1803 = vmatpush3.bf16.msra.mxu1 %v2223_v34 }
 0x59d   :  { %1267 = vmatprep.subr.bf16.mxu0 %v2208_v27  ;;  %1804 = vmatprep.subr.bf16.mxu1 %v2695_v5  ;;  %v2002_v27 = vld [vmem:[#allocation8 + $0x4] ss:$12 sps:$4 sm:$0xff]  }
 0x59e   :  { %1297 = vmatprep.mubr.bf16.mxu0 %v2696_v15  ;;  %1818 = vmatprep.mubr.msk.bf16.mxu1 %vm2128_vm0, %v2695_v5 }
 0x5a0   :  { %1268 = vmatpush1.bf16.msra.mxu0 %v2211_v29  ;;  %1805 = vmatpush3.bf16.msra.mxu1 %v2234_v39 }
 0x5a1   :  { %1269 = vmatprep.subr.bf16.mxu0 %v2215_v30  ;;  %1806 = vmatprep.subr.bf16.mxu1 %v2695_v5 }
 0x5a4   :  { %1270 = vmatpush1.bf16.msra.mxu0 %v2218_v32  ;;  %1807 = vmatpush3.bf16.msra.mxu1 %v2244_v42 }
 0x5a5   :  { %1271 = vmatprep.subr.bf16.mxu0 %v2221_v33  ;;  %1808 = vmatprep.subr.bf16.mxu1 %v2695_v5 }
 0x5a8   :  { %1272 = vmatpush1.bf16.msra.mxu0 %v2227_v36  ;;  %1809 = vmatpush3.bf16.msra.mxu1 %v2255_v46 }
 0x5a9   :  { %1273 = vmatprep.subr.bf16.mxu0 %v2231_v38  ;;  %1810 = vmatprep.subr.bf16.mxu1 %v2695_v5 }
 0x5ac   :  { %1274 = vmatpush1.bf16.msra.mxu0 %v2238_v40  ;;  %1811 = vmatpush3.bf16.msra.mxu1 %v2267_v49 }
 0x5ad   :  { %1275 = vmatprep.subr.bf16.mxu0 %v2241_v41  ;;  %1812 = vmatprep.subr.bf16.mxu1 %v2695_v5 }
 0x5b0   :  { %1276 = vmatpush1.bf16.msra.mxu0 %v2248_v44  ;;  %1813 = vmatpush3.bf16.msra.mxu1 %v2276_v51  ;;  %v2697_v44 = vld [vmem:[#allocation14_spill] sm:$0xff] }
 0x5b1   :  { %1277 = vmatprep.subr.bf16.mxu0 %v2252_v45  ;;  %1814 = vmatprep.subr.bf16.mxu1 %v2695_v5 }
 0x5b4   :  { %1278 = vmatpush1.bf16.msra.mxu0 %v2261_v47  ;;  %1815 = vmatpush3.bf16.msra.mxu1 %v2282_v52 }
 0x5b5   :  { %1279 = vmatprep.subr.bf16.mxu0 %v2264_v48  ;;  %1816 = vmatprep.subr.bf16.mxu1 %v2695_v5 }
 0x5b8   :  { %1280 = vmatpush1.bf16.msra.mxu0 %v2271_v50  ;;  %1817 = vmatpush3.bf16.msra.mxu1 %v2290_v53 }
 0x5b9   :  { %1374 = vmatprep.subr.bf16.mxu0 %v2002_v27  ;;  %1822 = vmatprep.subr.bf16.mxu1 %v2695_v5 }
 0x66e   :  { %v1190_v29 = vpop.f32.mrb[36].mxu0  ;;  %v1231_v30 = vpop.f32.mrb[28].mxu1 }
 0x66f   :  { %v1191_v32 = vadd.f32 %v1190_v29, %v2392_v6  ;;  %v1192_v33 = vpop.f32.mrb[37].mxu0  ;;  %v1800_v34 = vpop.f32.mrb[29].mxu1  ;;  %v1232_v52 = vadd.f32 %v1231_v30, %v2400_v60  ;;  %v2699_v30 = vld [vmem:[#allocation17_spill] sm:$0xff] }
 0x670   :  { %v1193_v36 = vadd.f32 %v1192_v33, %v2394_v10  ;;  %v1194_v38 = vpop.f32.mrb[38].mxu0  ;;  %v1234_v39 = vpop.f32.mrb[30].mxu1 }
 0x671   :  { %v1243_v40 = vadd.f32 %v1191_v32, %v2365_v37  ;;  %v1195_v41 = vpop.f32.mrb[39].mxu0  ;;  %v1801_v42 = vpop.f32.mrb[31].mxu1 }
 0x672   :  { %v1250_v45 = vadd.f32 %v1193_v36, %v2697_v44  ;;  %v2700_v36 = vld [vmem:[#allocation18_spill] sm:$0xff] }
 0x673   :  { %v1568_v46 = vmul.f32 -1.442695, %v1243_v40 }
 0x674   :  { %v1569_v47 = vmul.f32 -1.442695, %v1250_v45 }
 0x675   :  { %1971 = vpow2.f32 %v1568_v46 }
 0x676   :  { %1973 = vpow2.f32 %v1569_v47 }
 0x67f   :  { %v1972_v48 = vpop.eup %1971 }
 0x680   :  { %v1247_v49 = vadd.f32 1.0, %v1972_v48  ;;  %v1974_v50 = vpop.eup %1973  ;;  %v2701_v48 = vld [vmem:[#allocation13_spill] sm:$0xff] }
 0x681   :  { %v1254_v51 = vadd.f32 1.0, %v1974_v50 }
 0x682   :  { %1975 = vrcp.f32 %v1247_v49 }
 0x683   :  { %1977 = vrcp.f32 %v1254_v51 }
 0x68c   :  { %v1976_v53 = vpop.eup %1975 }
 0x68d   :  { %v1257_v2 = vmul.f32 %v1976_v53, %v1232_v52  ;;  %v1978_v9 = vpop.eup %1977 }
 0x68e   :  { %v1260_v59 = vsub.f32 1.0, %v1978_v9  ;;  %v1262_v26 = vmul.f32 %v1978_v9, %v2588_v12 }
 0x68f   :  { %v1258_v37 = vadd.f32 %v1257_v2, %v2698_v16 }
 0x691   :  { %1979 = vtanh.f32 %v1258_v37 }
 0x69b   :  { %v1980_v20 = vpop.eup %1979 }
 0x69c   :  { %v1261_v0 = vmul.f32 %v1980_v20, %v1260_v59 }
 0x69e   :  { %v2635_v18 = vadd.f32 %v1262_v26, %v1261_v0 }
 0x6a0   :  { %v1264_v57 = vpack.c.bf16 %v2635_v18, %v2635_v18 }
 0x6a2   :  { %1298 = vmatmul.mubr.bf16.vlgmr.msra.gmra.mrb[40].mxu0 %v1264_v57  ;;  %1819 = vmatmul.mubr.bf16.vlgmr.msra.gmra.mrb[32].mxu1 %v1264_v57 }
 0x6a3   :  { %1375 = vmatpush1.bf16.msra.mxu0 %v2592_v56  ;;  %1823 = vmatpush3.bf16.msra.mxu1 %v2003_v14 }
 0x6a4   :  { %1376 = vmatprep.subr.bf16.mxu0 %v2004_v58  ;;  %1824 = vmatprep.subr.bf16.mxu1 %v2695_v5 }
 0x6a5   :  { %1406 = vmatprep.mubr.bf16.mxu0 %v2696_v15  ;;  %1838 = vmatprep.mubr.msk.bf16.mxu1 %vm2128_vm0, %v2695_v5  ;;  %v2011_v15 = vld [vmem:[#allocation8 + $0x48] ss:$12 sps:$4 sm:$0xff]  }
 0x6a7   :  { %1377 = vmatpush1.bf16.msra.mxu0 %v2005_v19  ;;  %1825 = vmatpush3.bf16.msra.mxu1 %v2006_v61  ;;  %v2702_v19 = vld [vmem:[#allocation19_spill] sm:$0xff] }
 0x6a8   :  { %1378 = vmatprep.subr.bf16.mxu0 %v2007_v62  ;;  %1826 = vmatprep.subr.bf16.mxu1 %v2695_v5 }
 0x6ab   :  { %1379 = vmatpush1.bf16.msra.mxu0 %v2008_v35  ;;  %1827 = vmatpush3.bf16.msra.mxu1 %v2009_v3  ;;  %v2703_v3 = vld [vmem:[#allocation20_spill] sm:$0xff] }
 0x6ac   :  { %1380 = vmatprep.subr.bf16.mxu0 %v2010_v54  ;;  %1828 = vmatprep.subr.bf16.mxu1 %v2695_v5 }
 0x6af   :  { %1381 = vmatpush1.bf16.msra.mxu0 %v2011_v15  ;;  %1829 = vmatpush3.bf16.msra.mxu1 %v2012_v8 }
 0x6b0   :  { %1382 = vmatprep.subr.bf16.mxu0 %v2013_v17  ;;  %1830 = vmatprep.subr.bf16.mxu1 %v2695_v5 }
 0x6b3   :  { %1383 = vmatpush1.bf16.msra.mxu0 %v2014_v24  ;;  %1831 = vmatpush3.bf16.msra.mxu1 %v2015_v11 }
 0x6b4   :  { %1384 = vmatprep.subr.bf16.mxu0 %v2016_v21  ;;  %1832 = vmatprep.subr.bf16.mxu1 %v2695_v5 }
 0x6b7   :  { %1385 = vmatpush1.bf16.msra.mxu0 %v2017_v31  ;;  %1833 = vmatpush3.bf16.msra.mxu1 %v2018_v63  ;;  %v2704_v31 = vld [vmem:[#allocation15_spill] sm:$0xff] }
 0x6b8   :  { %1386 = vmatprep.subr.bf16.mxu0 %v2019_v13  ;;  %1834 = vmatprep.subr.bf16.mxu1 %v2695_v5 }
 0x6bb   :  { %1387 = vmatpush1.bf16.msra.mxu0 %v2020_v55  ;;  %1835 = vmatpush3.bf16.msra.mxu1 %v2021_v1 }
 0x6bc   :  { %1388 = vmatprep.subr.bf16.mxu0 %v2022_v22  ;;  %1836 = vmatprep.subr.bf16.mxu1 %v2695_v5 }
 0x6bf   :  { %1389 = vmatpush1.bf16.msra.mxu0 %v2023_v28  ;;  %1837 = vmatpush3.bf16.msra.mxu1 %v2024_v23 }
 0x775   :  { %v1299_v25 = vpop.f32.mrb[40].mxu0  ;;  %v1340_v4 = vpop.f32.mrb[32].mxu1 }
 0x776   :  { %v1300_v7 = vadd.f32 %v1299_v25, %v2392_v6  ;;  %v1301_v12 = vpop.f32.mrb[41].mxu0  ;;  %v1820_v43 = vpop.f32.mrb[33].mxu1  ;;  %v1341_v45 = vadd.f32 %v1340_v4, %v2400_v60 }
 0x777   :  { %v1302_v56 = vadd.f32 %v1301_v12, %v2394_v10  ;;  %v1303_v27 = vpop.f32.mrb[42].mxu0  ;;  %v1343_v29 = vpop.f32.mrb[34].mxu1 }
 0x778   :  { %v1352_v32 = vadd.f32 %v1300_v7, %v2699_v30  ;;  %v1304_v33 = vpop.f32.mrb[43].mxu0  ;;  %v1821_v34 = vpop.f32.mrb[35].mxu1 }
 0x779   :  { %v1359_v5 = vadd.f32 %v1302_v56, %v2700_v36 }
 0x77a   :  { %v1570_v38 = vmul.f32 -1.442695, %v1352_v32 }
 0x77b   :  { %v1571_v39 = vmul.f32 -1.442695, %v1359_v5 }
 0x77c   :  { %1981 = vpow2.f32 %v1570_v38 }
 0x77d   :  { %1983 = vpow2.f32 %v1571_v39 }
 0x786   :  { %v1982_v40 = vpop.eup %1981 }
 0x787   :  { %v1356_v41 = vadd.f32 1.0, %v1982_v40  ;;  %v1984_v42 = vpop.eup %1983 }
 0x788   :  { %v1363_v44 = vadd.f32 1.0, %v1984_v42 }
 0x789   :  { %1985 = vrcp.f32 %v1356_v41 }
 0x78a   :  { %1987 = vrcp.f32 %v1363_v44 }
 0x793   :  { %v1986_v46 = vpop.eup %1985 }
 0x794   :  { %v1366_v47 = vmul.f32 %v1986_v46, %v1341_v45  ;;  %v1988_v50 = vpop.eup %1987 }
 0x795   :  { %v1369_v51 = vsub.f32 1.0, %v1988_v50  ;;  %v1371_v2 = vmul.f32 %v1988_v50, %v2635_v18 }
 0x796   :  { %v1367_v49 = vadd.f32 %v1366_v47, %v2701_v48 }
 0x798   :  { %1989 = vtanh.f32 %v1367_v49 }
 0x7a2   :  { %v1990_v52 = vpop.eup %1989 }
 0x7a3   :  { %v1370_v53 = vmul.f32 %v1990_v52, %v1369_v51 }
 0x7a5   :  { %v1372_v16 = vadd.f32 %v1371_v2, %v1370_v53 }
 0x7a7   :  { %v1373_v37 = vpack.c.bf16 %v1372_v16, %v1372_v16 }
 0x7a9   :  { %1407 = vmatmul.mubr.bf16.vlgmr.msra.gmra.mrb[44].mxu0 %v1373_v37  ;;  %1839 = vmatmul.mubr.bf16.vlgmr.msra.gmra.mrb[36].mxu1 %v1373_v37 }
 0x87c   :  { %v1408_v9 = vpop.f32.mrb[44].mxu0  ;;  %v1449_v59 = vpop.f32.mrb[36].mxu1 }
 0x87d   :  { %v1409_v20 = vadd.f32 %v1408_v9, %v2392_v6  ;;  %v1410_v0 = vpop.f32.mrb[45].mxu0  ;;  %v1840_v26 = vpop.f32.mrb[37].mxu1  ;;  %v1450_v11 = vadd.f32 %v1449_v59, %v2400_v60 }
 0x87e   :  { %v1411_v57 = vadd.f32 %v1410_v0, %v2394_v10  ;;  %v1412_v14 = vpop.f32.mrb[46].mxu0  ;;  %v1452_v58 = vpop.f32.mrb[38].mxu1 }
 0x87f   :  { %v1461_v61 = vadd.f32 %v1409_v20, %v2702_v19  ;;  %v1413_v62 = vpop.f32.mrb[47].mxu0  ;;  %v1841_v35 = vpop.f32.mrb[39].mxu1 }
 0x880   :  { %v1468_v18 = vadd.f32 %v1411_v57, %v2703_v3 }
 0x881   :  { %v1572_v54 = vmul.f32 -1.442695, %v1461_v61 }
 0x882   :  { %v1573_v15 = vmul.f32 -1.442695, %v1468_v18 }
 0x883   :  { %1991 = vpow2.f32 %v1572_v54 }
 0x884   :  { %1993 = vpow2.f32 %v1573_v15 }
 0x88d   :  { %v1992_v8 = vpop.eup %1991 }
 0x88e   :  { %v1465_v17 = vadd.f32 1.0, %v1992_v8  ;;  %v1994_v6 = vpop.eup %1993 }
 0x88f   :  { %v1472_v24 = vadd.f32 1.0, %v1994_v6 }
 0x890   :  { %1995 = vrcp.f32 %v1465_v17 }
 0x891   :  { %1997 = vrcp.f32 %v1472_v24 }
 0x89a   :  { %v1996_v10 = vpop.eup %1995 }
 0x89b   :  { %v1475_v21 = vmul.f32 %v1996_v10, %v1450_v11  ;;  %v1998_v13 = vpop.eup %1997 }
 0x89c   :  { %v1478_v55 = vsub.f32 1.0, %v1998_v13  ;;  %v1480_v28 = vmul.f32 %v1998_v13, %v1372_v16 }
 0x89d   :  { %v1476_v63 = vadd.f32 %v1475_v21, %v2704_v31 }
 0x89f   :  { %1999 = vtanh.f32 %v1476_v63 }
 0x8a9   :  { %v2000_v1 = vpop.eup %1999 }
 0x8aa   :  { %v1479_v22 = vmul.f32 %v2000_v1, %v1478_v55 }
 0x8ac   :  { %v1481_v23 = vadd.f32 %v1480_v28, %v1479_v22 }
 0x8ae   :  { %1482 = vst [vmem:[#allocation9] sm:$0xff] %v1481_v23 }
 0x8af   :  { %2102 = shalt.err (!%p2099_p0)
}
 0x8b0   :  { %s2103_s12 = scalar_lea.hbm %s2680_s5, 128 }
 0x8b1   :  { %p2104_p1 = scmp.ne.s32.totalorder %s2680_s5, %s2103_s12  ;;  %p2107_p2 = scmp.lt.u32.totalorder %s2103_s12, %s2680_s5 }
 0x8b3   :  { %p2109_p3 = pnand %p2107_p2, %p2104_p1 }
 0x8b5   :  { %2112 = shalt.err (!%p2109_p3)
}
 0x8b6   :  { %1492 = dma.vmem_to_hbm [thread:$0]  %s1490_s8, 128, %s2680_s5, [#allocation5]  }
 0x8b7   :  { %2117 = dma.done.wait [#allocation5], 128  }
 0x8b8   :  { %2118 = vsyncadd [#allocation5], 4294967168 }
 0x8b9   :  { %1496 = vsyncpa [#allocation4], 1 }
 0x8ba   :  { %1497 = vsyncpa [#allocation7], 1 }
 0x8bb   :  { %1498 = vsyncpa [#allocation5], 1 }

</bundles_post_ra>
